<compile_context>
chip_gen: v7x
topology: tpu7x:2x2x1
jax: 0.10.0
libtpu: 0.0.40
codegen_flags: <defaults>
</compile_context>

<pallas_src>
import functools
import math

import jax
import jax.numpy as jnp
from jax import lax
from jax.experimental import pallas as pl
from jax.experimental.pallas import tpu as pltpu


def _vmem_limit_bytes():
    # v5e / v6e have 128 MiB physical VMEM -> generous scoped limit; v7x has
    # only 64 MiB physical -> keep the conservative 32 MiB scoped default.
    try:
        kind = jax.devices()[0].device_kind.lower()
    except Exception:
        kind = ""
    if "v5" in kind or "v6" in kind:
        return 64 * 1024 * 1024
    return 32 * 1024 * 1024


_VMEM_LIMIT_BYTES = _vmem_limit_bytes()
_ATTN_VMEM_BUDGET = _VMEM_LIMIT_BYTES // 4

_LINEAR_TM_CAP = 512
_LINEAR_TN_CAP = 512
_LINEAR_TK_CAP = 1024   # fewer K steps -> less f32 accumulator VMEM traffic (v5e)


def _largest_divisor_leq(n, cap):
    cap = max(1, min(cap, n))
    for c in range(cap, 0, -1):
        if n % c == 0:
            return c
    return 1


def _pick_tile(dim, cap, min_align):
    """Layout-friendly divisor tile: the full dim when it fits under `cap`,
    else the largest divisor <= cap aligned to 256/128/.../min_align, else the
    full dim (the only always-legal tile for non-aligned dims)."""
    if dim <= cap:
        return dim
    align = 256
    while align >= min_align:
        c = (cap // align) * align
        while c >= align:
            if dim % c == 0:
                return c
            c -= align
        align //= 2
    # TODO(synk): cdiv grid + masked edge tiles if a non-8-aligned dim ever
    # grows large enough to threaten the VMEM budget.
    return dim


def _pick_head_block(bh, t, s, d, budget_bytes, sublane_aligned):
    """Heads per attention grid step."""
    # Per-head f32 working set (q,o: t*d each; k,v: s*d each; scores+weights:
    # 2*t*s), x3 for double-buffered pipelining + in-kernel temporaries.
    per_head = 3 * 4 * (2 * t * d + 2 * s * d + 2 * t * s)
    cap = max(1, budget_bytes // per_head)
    if bh >= 16:
        cap = min(cap, bh // 2)   # >= 2 grid steps so both v7x TensorCores get work
    cap = min(cap, 64)            # bound the per-step working set
    if not sublane_aligned:
        return _largest_divisor_leq(bh, cap)
    # Time-major blocks put the head dim in the sublane slot: hb must be a
    # multiple of 8 (or the full extent) to satisfy the (8, 128) layout rule.
    best = 0
    m = 8
    while m <= min(cap, bh):
        if bh % m == 0:
            best = m
        m += 8
    if best:
        return best
    # No 8-aligned head block fits the budget: the full extent is always legal.
    # TODO(synk): flash/online-softmax tiling over S for very long sequences.
    return bh


# ----------------------------------------------------------------------------
# Kernel 1: tiled dense layer  y = x @ W^T + b   (in-proj and out-proj)
#   grid = (M//TM, N//TN, K//TK); f32 VMEM accumulator; bf16 MXU inputs.
# ----------------------------------------------------------------------------
def _linear_kernel(x_ref, w_ref, b_ref, o_ref, acc_ref):
    @pl.when(pl.program_id(2) == 0)
    def _():
        acc_ref[...] = jnp.zeros_like(acc_ref)

    # x: (TM, TK), w: (TN, TK) -> contract last dims; bf16 inputs, f32 accum.
    acc_ref[...] += lax.dot_general(
        x_ref[...].astype(jnp.bfloat16),
        w_ref[...].astype(jnp.bfloat16),
        dimension_numbers=(((1,), (1,)), ((), ())),
        preferred_element_type=jnp.float32,
    )

    @pl.when(pl.program_id(2) == pl.num_programs(2) - 1)
    def _():
        o_ref[...] = (acc_ref[...] + b_ref[...]).astype(o_ref.dtype)


def pallas_linear(x, w, b):
    # x: (N, Din), w: (Dout, Din), b: (Dout,) -> (N, Dout)
    n, d_in = x.shape
    d_out = w.shape[0]
    tm = _pick_tile(n, _LINEAR_TM_CAP, 8)        # sublane dim of x / out blocks
    tn = _pick_tile(d_out, _LINEAR_TN_CAP, 128)  # lane dim of out, sublane of w
    tk = _pick_tile(d_in, _LINEAR_TK_CAP, 128)   # lane dim of x / w blocks
    b2 = b.reshape(1, d_out)

    return pl.pallas_call(
        _linear_kernel,
        out_shape=jax.ShapeDtypeStruct((n, d_out), x.dtype),
        grid_spec=pltpu.PrefetchScalarGridSpec(
            num_scalar_prefetch=0,
            grid=(n // tm, d_out // tn, d_in // tk),
            in_specs=[
                pl.BlockSpec((tm, tk), lambda i, j, k: (i, k)),
                pl.BlockSpec((tn, tk), lambda i, j, k: (j, k)),
                pl.BlockSpec((1, tn), lambda i, j, k: (0, j)),
            ],
            out_specs=pl.BlockSpec((tm, tn), lambda i, j, k: (i, j)),
            scratch_shapes=[pltpu.VMEM((tm, tn), jnp.float32)],
        ),
        compiler_params=pltpu.CompilerParams(
            dimension_semantics=("parallel", "parallel", "arbitrary"),
            vmem_limit_bytes=_VMEM_LIMIT_BYTES,
        ),
    )(x, w, b2)


# ----------------------------------------------------------------------------
# Kernel 2: attention core for a block of heads per grid step.
#   (q is already scaled by head_dim ** -0.5 — folded into the in-projection.)
# ----------------------------------------------------------------------------
def _swap01(x):
    """(a, b, d) -> (b, a, d) in VMEM (lane dim untouched)."""
    if hasattr(pltpu, "einshape"):
        return pltpu.einshape("abd->bad", x)
    return jnp.swapaxes(x, 0, 1)


def _softmax_attention(q, k, v, want_weights):
    # q: (HB, T, D), k/v: (HB, S, D); f32 in, f32 out; bf16 MXU inputs.
    s = jnp.einsum("bqd,bkd->bqk",
                   q.astype(jnp.bfloat16), k.astype(jnp.bfloat16),
                   preferred_element_type=jnp.float32)          # (HB, T, S)
    s = s - jnp.max(s, axis=-1, keepdims=True)
    p = jnp.exp(s)
    denom = jnp.sum(p, axis=-1, keepdims=True)
    if want_weights:
        w = p / denom                       # exact softmax (module return contract)
        pn = w
    else:
        w = None
        pn = p * pl.reciprocal(denom, approx=True)   # EUP slot, output path only
    o = jnp.einsum("bqk,bkd->bqd",
                   pn.astype(jnp.bfloat16), v.astype(jnp.bfloat16),
                   preferred_element_type=jnp.float32)          # (HB, T, D)
    return o, w


def _attn_fused_kernel(q_ref, k_ref, v_ref, o_ref, w_ref):
    # Time-major blocks: q (T, HB, D), k/v (S, HB, D).  The head-major swap is
    # an in-VMEM relayout (no HBM transpose anywhere on this path).
    q = _swap01(q_ref[...])
    k = _swap01(k_ref[...])
    v = _swap01(v_ref[...])
    o, w = _softmax_attention(q, k, v, want_weights=w_ref is not None)
    o_ref[...] = _swap01(o).astype(o_ref.dtype)
    if w_ref is not None:
        w_ref[...] = w.astype(w_ref.dtype)


def _attn_fused_kernel_nw(q_ref, k_ref, v_ref, o_ref):
    _attn_fused_kernel(q_ref, k_ref, v_ref, o_ref, None)


def _attn_headmajor_kernel(q_ref, k_ref, v_ref, o_ref, w_ref):
    # Head-major blocks: q (HB, T, D), k/v (HB, S, D).  Fallback path.
    o, w = _softmax_attention(q_ref[...], k_ref[...], v_ref[...],
                              want_weights=w_ref is not None)
    o_ref[...] = o.astype(o_ref.dtype)
    if w_ref is not None:
        w_ref[...] = w.astype(w_ref.dtype)


def _attn_headmajor_kernel_nw(q_ref, k_ref, v_ref, o_ref):
    _attn_headmajor_kernel(q_ref, k_ref, v_ref, o_ref, None)


def _attention_call(q, k, v, *, need_weights, fused):
    if fused:
        t, bh, d = q.shape
        s = k.shape[0]
    else:
        bh, t, d = q.shape
        s = k.shape[1]
    hb = _pick_head_block(bh, t, s, d, _ATTN_VMEM_BUDGET, sublane_aligned=fused)
    grid = (bh // hb,)

    if fused:
        qspec = pl.BlockSpec((t, hb, d), lambda i: (0, i, 0))
        kspec = pl.BlockSpec((s, hb, d), lambda i: (0, i, 0))
        vspec = pl.BlockSpec((s, hb, d), lambda i: (0, i, 0))
        ospec = pl.BlockSpec((t, hb, d), lambda i: (0, i, 0))
        oshape = jax.ShapeDtypeStruct((t, bh, d), q.dtype)
        kernel = _attn_fused_kernel if need_weights else _attn_fused_kernel_nw
    else:
        qspec = pl.BlockSpec((hb, t, d), lambda i: (i, 0, 0))
        kspec = pl.BlockSpec((hb, s, d), lambda i: (i, 0, 0))
        vspec = pl.BlockSpec((hb, s, d), lambda i: (i, 0, 0))
        ospec = pl.BlockSpec((hb, t, d), lambda i: (i, 0, 0))
        oshape = jax.ShapeDtypeStruct((bh, t, d), q.dtype)
        kernel = _attn_headmajor_kernel if need_weights else _attn_headmajor_kernel_nw

    # TODO(synk): pipeline_mode=pl.Buffered(3) on the k/v specs if profiling
    # shows exposed DMA at head-block boundaries on v5e.
    cp = pltpu.CompilerParams(
        dimension_semantics=("parallel",),
        vmem_limit_bytes=_VMEM_LIMIT_BYTES,
    )

    if need_weights:
        wspec = pl.BlockSpec((hb, t, s), lambda i: (i, 0, 0))
        wshape = jax.ShapeDtypeStruct((bh, t, s), jnp.float32)
        o, w = pl.pallas_call(
            kernel,
            out_shape=(oshape, wshape),
            grid=grid,
            in_specs=[qspec, kspec, vspec],
            out_specs=(ospec, wspec),
            compiler_params=cp,
        )(q, k, v)
        return o, w

    o = pl.pallas_call(
        kernel,
        out_shape=oshape,
        grid=grid,
        in_specs=[qspec, kspec, vspec],
        out_specs=ospec,
        compiler_params=cp,
    )(q, k, v)
    return o, None


# ----------------------------------------------------------------------------
# Full forward pass (glue in plain JAX, hot paths in Pallas)
# ----------------------------------------------------------------------------
@functools.partial(jax.jit, static_argnames=("num_heads", "need_weights", "fused"))
def _mha_forward(query, key, value, params, *, num_heads, need_weights, fused):
    t, b, e = query.shape
    s = key.shape[0]
    h = num_heads
    d = e // h
    scaling = d ** (-0.5)

    w_in = params["in_proj_weight"]       # (3E, E)
    b_in = params["in_proj_bias"]         # (3E,)

    # Fold the q-scaling into the q in-projection weight/bias (trace time, free).
    w_q = w_in[:e] * scaling
    b_q = b_in[:e] * scaling

    # Three separate projections (instead of packed E->3E + minor-dim slices):
    # separate outputs reshape for free into the attention layout, with no
    # extra HBM pass for the qkv split.
    q2 = pallas_linear(query.reshape(t * b, e), w_q, b_q)
    k2 = pallas_linear(key.reshape(s * b, e), w_in[e:2 * e], b_in[e:2 * e])
    v2 = pallas_linear(value.reshape(s * b, e), w_in[2 * e:], b_in[2 * e:])

    if fused:
        # (T*B, E) -> (T, B*H, D) is a pure row-major reshape: no HBM transpose.
        q3 = q2.reshape(t, b * h, d)
        k3 = k2.reshape(s, b * h, d)
        v3 = v2.reshape(s, b * h, d)
        attn, attn_weights = _attention_call(q3, k3, v3,
                                             need_weights=need_weights, fused=True)
        attn2d = attn.reshape(t * b, e)               # pure reshape again
    else:
        # Fallback head-major layout: explicit (HBM) transposes, proven lowering.
        q3 = q2.reshape(t, b * h, d).transpose(1, 0, 2)
        k3 = k2.reshape(s, b * h, d).transpose(1, 0, 2)
        v3 = v2.reshape(s, b * h, d).transpose(1, 0, 2)
        attn, attn_weights = _attention_call(q3, k3, v3,
                                             need_weights=need_weights, fused=False)
        attn2d = attn.transpose(1, 0, 2).reshape(t * b, e)

    # TODO(synk): attn_mask / add_bias_kv / add_zero_attn / dropout>0 not wired
    # (module defaults: attn_mask=None, add_bias_kv=False, add_zero_attn=False,
    #  attn_dropout=0.0 -> identity).
    out = pallas_linear(attn2d, params["out_proj_weight"], params["out_proj_bias"])
    return out.reshape(t, b, e), attn_weights


_FUSED_LAYOUT_OK = None


def multihead_attention_forward(query, key, value, params, *, num_heads,
                                need_weights=True):
    """Forward pass matching MultiheadAttention.forward (attn_mask=None path)."""
    global _FUSED_LAYOUT_OK
    if _FUSED_LAYOUT_OK is None:
        try:
            res = _mha_forward(query, key, value, params, num_heads=num_heads,
                               need_weights=need_weights, fused=True)
            jax.block_until_ready(res)
            _FUSED_LAYOUT_OK = True
            return res
        except Exception:
            # The transpose-free layout did not lower on this toolchain/arch;
            # fall back to the head-major layout (costs extra HBM transposes).
            _FUSED_LAYOUT_OK = False
    return _mha_forward(query, key, value, params, num_heads=num_heads,
                        need_weights=need_weights, fused=_FUSED_LAYOUT_OK)


# ----------------------------------------------------------------------------
# Pure-JAX reference (for correctness checking of the Pallas path)
# ----------------------------------------------------------------------------
def _reference_forward(query, key, value, params, num_heads):
    t, b, e = query.shape
    s = key.shape[0]
    h = num_heads
    d = e // h
    w_in = params["in_proj_weight"]
    b_in = params["in_proj_bias"]
    q = query @ w_in[:e].T + b_in[:e]
    k = key @ w_in[e:2 * e].T + b_in[e:2 * e]
    v = value @ w_in[2 * e:].T + b_in[2 * e:]
    q = q * (d ** (-0.5))
    q = q.reshape(t, b * h, d).transpose(1, 0, 2)
    k = k.reshape(s, b * h, d).transpose(1, 0, 2)
    v = v.reshape(s, b * h, d).transpose(1, 0, 2)
    scores = jnp.einsum("bqd,bkd->bqk", q, k)
    w = jax.nn.softmax(scores, axis=-1)
    attn = jnp.einsum("bqk,bkd->bqd", w, v)
    attn = attn.transpose(1, 0, 2).reshape(t, b, e)
    out = attn @ params["out_proj_weight"].T + params["out_proj_bias"]
    return out, w


# ----------------------------------------------------------------------------
# Deterministic parameter init (xavier_uniform weights; small random biases so
# the bias-add path is exercised by the correctness check).
# ----------------------------------------------------------------------------
def init_params(key, embed_dim):
    k1, k2, k3, k4 = jax.random.split(key, 4)

    def xavier_uniform(k, shape):
        fan_out, fan_in = shape
        bound = math.sqrt(6.0 / (fan_in + fan_out))
        return jax.random.uniform(k, shape, jnp.float32, -bound, bound)

    return {
        "in_proj_weight": xavier_uniform(k1, (3 * embed_dim, embed_dim)),
        "in_proj_bias": 0.02 * jax.random.normal(k3, (3 * embed_dim,), jnp.float32),
        "out_proj_weight": xavier_uniform(k2, (embed_dim, embed_dim)),
        "out_proj_bias": 0.02 * jax.random.normal(k4, (embed_dim,), jnp.float32),
    }


if __name__ == "__main__":
    # Small shapes consistent with the module: Time x Batch x Channel.
    tgt_len, src_len, bsz, embed_dim, num_heads = 8, 16, 2, 32, 4

    root = jax.random.PRNGKey(0)
    kp, kq, kk, kv = jax.random.split(root, 4)

    params = init_params(kp, embed_dim)

    query = jax.random.normal(kq, (tgt_len, bsz, embed_dim), jnp.float32)
    key_ = jax.random.normal(kk, (src_len, bsz, embed_dim), jnp.float32)
    value = jax.random.normal(kv, (src_len, bsz, embed_dim), jnp.float32)

    # --- cross-attention path (T != S) ---
    out, attn_w = multihead_attention_forward(
        query, key_, value, params, num_heads=num_heads
    )
    jax.block_until_ready((out, attn_w))
    ref_out, ref_w = _reference_forward(query, key_, value, params, num_heads)

    assert out.shape == (tgt_len, bsz, embed_dim)
    assert attn_w.shape == (bsz * num_heads, tgt_len, src_len)
    assert bool(jnp.allclose(jnp.sum(attn_w, axis=-1), 1.0, atol=1e-3))
    assert bool(jnp.allclose(out, ref_out, rtol=3e-2, atol=3e-2))
    assert bool(jnp.allclose(attn_w, ref_w, rtol=2e-2, atol=2e-2))

    # --- self-attention path (same tensor for q/k/v) ---
    out_s, attn_w_s = multihead_attention_forward(
        query, query, query, params, num_heads=num_heads
    )
    jax.block_until_ready((out_s, attn_w_s))
    ref_out_s, ref_w_s = _reference_forward(query, query, query, params, num_heads)

    assert out_s.shape == (tgt_len, bsz, embed_dim)
    assert attn_w_s.shape == (bsz * num_heads, tgt_len, tgt_len)
    assert bool(jnp.allclose(out_s, ref_out_s, rtol=3e-2, atol=3e-2))
    assert bool(jnp.allclose(attn_w_s, ref_w_s, rtol=2e-2, atol=2e-2))

    # --- need_weights=False fast path (skips the (BH, T, S) weights HBM write) ---
    out_nw, w_none = multihead_attention_forward(
        query, key_, value, params, num_heads=num_heads, need_weights=False
    )
    jax.block_until_ready(out_nw)
    assert w_none is None
    assert bool(jnp.allclose(out_nw, ref_out, rtol=3e-2, atol=3e-2))

    print("KERNEL_OK")
</pallas_src>

<mosaic_0001>
module attributes {stable_mosaic.version = 11 : i64} {
  func.func @_linear_kernel(%arg0: i32, %arg1: i32, %arg2: i32, %arg3: memref<32x32xf32, #tpu.memory_space<vmem>>, %arg4: memref<32x32xf32, #tpu.memory_space<vmem>>, %arg5: memref<1x32xf32, #tpu.memory_space<vmem>>, %arg6: memref<32x32xf32, #tpu.memory_space<vmem>>, %arg7: memref<32x32xf32, #tpu.memory_space<vmem>>) attributes {dimension_semantics = [#tpu.dimension_semantics<parallel>, #tpu.dimension_semantics<parallel>, #tpu.dimension_semantics<arbitrary>], iteration_bounds = array<i64: 1, 1, 1>, scalar_prefetch = 0 : i64, scratch_operands = 1 : i64, tpu.core_type = #tpu.core_type<tc>, window_params = [{transform_indices = @transform_0, window_bounds = array<i64: 32, 32>}, {transform_indices = @transform_1, window_bounds = array<i64: 32, 32>}, {transform_indices = @transform_2, window_bounds = array<i64: 1, 32>}, {transform_indices = @transform_3, window_bounds = array<i64: 32, 32>}]} {
    %c0_i32 = arith.constant 0 : i32
    %0 = arith.cmpi eq, %arg2, %c0_i32 : i32
    %1 = arith.extui %0 : i1 to i32
    %c0_i32_0 = arith.constant 0 : i32
    %2 = arith.cmpi ne, %1, %c0_i32_0 : i32
    scf.if %2 {
      %cst_10 = arith.constant 0.000000e+00 : f32
      %14 = vector.broadcast %cst_10 : f32 to vector<32x32xf32>
      %c0_11 = arith.constant 0 : index
      %c0_12 = arith.constant 0 : index
      %15 = vector.load %arg7[%c0_11, %c0_12] : memref<32x32xf32, #tpu.memory_space<vmem>>, vector<32x32xf32>
      tpu.vector_store %arg7[%c0_11, %c0_12], %14 {strides = array<i32>} : memref<32x32xf32, #tpu.memory_space<vmem>>, vector<32x32xf32>,
    } else {
    }
    %c0 = arith.constant 0 : index
    %c0_1 = arith.constant 0 : index
    %3 = vector.load %arg7[%c0, %c0_1] : memref<32x32xf32, #tpu.memory_space<vmem>>, vector<32x32xf32>
    %c0_2 = arith.constant 0 : index
    %c0_3 = arith.constant 0 : index
    %4 = vector.load %arg3[%c0_2, %c0_3] : memref<32x32xf32, #tpu.memory_space<vmem>>, vector<32x32xf32>
    %5 = arith.truncf %4 : vector<32x32xf32> to vector<32x32xbf16>
    %c0_4 = arith.constant 0 : index
    %c0_5 = arith.constant 0 : index
    %6 = vector.load %arg4[%c0_4, %c0_5] : memref<32x32xf32, #tpu.memory_space<vmem>>, vector<32x32xf32>
    %7 = arith.truncf %6 : vector<32x32xf32> to vector<32x32xbf16>
    %cst = arith.constant dense<0.000000e+00> : vector<32x32xf32>
    %8 = tpu.matmul %5, %7, %cst {dimension_numbers = #tpu.dot_dimension_numbers<[1], [1], [0], [0], [0, 0, 1, 0], [], []>} : vector<32x32xbf16>, vector<32x32xbf16>, vector<32x32xf32> -> vector<32x32xf32>
    %9 = arith.addf %3, %8 : vector<32x32xf32>
    %c0_6 = arith.constant 0 : index
    %c0_7 = arith.constant 0 : index
    %10 = vector.load %arg7[%c0_6, %c0_7] : memref<32x32xf32, #tpu.memory_space<vmem>>, vector<32x32xf32>
    tpu.vector_store %arg7[%c0_6, %c0_7], %9 {strides = array<i32>} : memref<32x32xf32, #tpu.memory_space<vmem>>, vector<32x32xf32>,
    %c0_i32_8 = arith.constant 0 : i32
    %11 = arith.cmpi eq, %arg2, %c0_i32_8 : i32
    %12 = arith.extui %11 : i1 to i32
    %c0_i32_9 = arith.constant 0 : i32
    %13 = arith.cmpi ne, %12, %c0_i32_9 : i32
    scf.if %13 {
      %c0_10 = arith.constant 0 : index
      %c0_11 = arith.constant 0 : index
      %14 = vector.load %arg7[%c0_10, %c0_11] : memref<32x32xf32, #tpu.memory_space<vmem>>, vector<32x32xf32>
      %c0_12 = arith.constant 0 : index
      %c0_13 = arith.constant 0 : index
      %15 = vector.load %arg5[%c0_12, %c0_13] : memref<1x32xf32, #tpu.memory_space<vmem>>, vector<1x32xf32>
      %16 = vector.broadcast %15 : vector<1x32xf32> to vector<32x32xf32>
      %17 = arith.addf %14, %16 : vector<32x32xf32>
      %c0_14 = arith.constant 0 : index
      %c0_15 = arith.constant 0 : index
      %18 = vector.load %arg6[%c0_14, %c0_15] : memref<32x32xf32, #tpu.memory_space<vmem>>, vector<32x32xf32>
      tpu.vector_store %arg6[%c0_14, %c0_15], %17 {strides = array<i32>} : memref<32x32xf32, #tpu.memory_space<vmem>>, vector<32x32xf32>,
    } else {
    }
    return
  }
  func.func @transform_0(%arg0: i32, %arg1: i32, %arg2: i32) -> (i32, i32) {
    %c0_i32 = arith.constant 0 : i32
    return %arg0, %arg2 : i32, i32
  }
  func.func @transform_1(%arg0: i32, %arg1: i32, %arg2: i32) -> (i32, i32) {
    %c0_i32 = arith.constant 0 : i32
    return %arg1, %arg2 : i32, i32
  }
  func.func @transform_2(%arg0: i32, %arg1: i32, %arg2: i32) -> (i32, i32) {
    %c0_i32 = arith.constant 0 : i32
    %c0_i32_0 = arith.constant 0 : i32
    return %c0_i32, %arg1 : i32, i32
  }
  func.func @transform_3(%arg0: i32, %arg1: i32, %arg2: i32) -> (i32, i32) {
    %c0_i32 = arith.constant 0 : i32
    return %arg0, %arg1 : i32, i32
  }
}

module attributes {stable_mosaic.version = 11 : i64} {
  func.func @_linear_kernel(%arg0: i32, %arg1: i32, %arg2: i32, %arg3: memref<16x32xf32, #tpu.memory_space<vmem>>, %arg4: memref<32x32xf32, #tpu.memory_space<vmem>>, %arg5: memref<1x32xf32, #tpu.memory_space<vmem>>, %arg6: memref<16x32xf32, #tpu.memory_space<vmem>>, %arg7: memref<16x32xf32, #tpu.memory_space<vmem>>) attributes {dimension_semantics = [#tpu.dimension_semantics<parallel>, #tpu.dimension_semantics<parallel>, #tpu.dimension_semantics<arbitrary>], iteration_bounds = array<i64: 1, 1, 1>, scalar_prefetch = 0 : i64, scratch_operands = 1 : i64, tpu.core_type = #tpu.core_type<tc>, window_params = [{transform_indices = @transform_0, window_bounds = array<i64: 16, 32>}, {transform_indices = @transform_1, window_bounds = array<i64: 32, 32>}, {transform_indices = @transform_2, window_bounds = array<i64: 1, 32>}, {transform_indices = @transform_3, window_bounds = array<i64: 16, 32>}]} {
    %c0_i32 = arith.constant 0 : i32
    %0 = arith.cmpi eq, %arg2, %c0_i32 : i32
    %1 = arith.extui %0 : i1 to i32
    %c0_i32_0 = arith.constant 0 : i32
    %2 = arith.cmpi ne, %1, %c0_i32_0 : i32
    scf.if %2 {
      %cst_10 = arith.constant 0.000000e+00 : f32
      %14 = vector.broadcast %cst_10 : f32 to vector<16x32xf32>
      %c0_11 = arith.constant 0 : index
      %c0_12 = arith.constant 0 : index
      %15 = vector.load %arg7[%c0_11, %c0_12] : memref<16x32xf32, #tpu.memory_space<vmem>>, vector<16x32xf32>
      tpu.vector_store %arg7[%c0_11, %c0_12], %14 {strides = array<i32>} : memref<16x32xf32, #tpu.memory_space<vmem>>, vector<16x32xf32>,
    } else {
    }
    %c0 = arith.constant 0 : index
    %c0_1 = arith.constant 0 : index
    %3 = vector.load %arg7[%c0, %c0_1] : memref<16x32xf32, #tpu.memory_space<vmem>>, vector<16x32xf32>
    %c0_2 = arith.constant 0 : index
    %c0_3 = arith.constant 0 : index
    %4 = vector.load %arg3[%c0_2, %c0_3] : memref<16x32xf32, #tpu.memory_space<vmem>>, vector<16x32xf32>
    %5 = arith.truncf %4 : vector<16x32xf32> to vector<16x32xbf16>
    %c0_4 = arith.constant 0 : index
    %c0_5 = arith.constant 0 : index
    %6 = vector.load %arg4[%c0_4, %c0_5] : memref<32x32xf32, #tpu.memory_space<vmem>>, vector<32x32xf32>
    %7 = arith.truncf %6 : vector<32x32xf32> to vector<32x32xbf16>
    %cst = arith.constant dense<0.000000e+00> : vector<16x32xf32>
    %8 = tpu.matmul %5, %7, %cst {dimension_numbers = #tpu.dot_dimension_numbers<[1], [1], [0], [0], [0, 0, 1, 0], [], []>} : vector<16x32xbf16>, vector<32x32xbf16>, vector<16x32xf32> -> vector<16x32xf32>
    %9 = arith.addf %3, %8 : vector<16x32xf32>
    %c0_6 = arith.constant 0 : index
    %c0_7 = arith.constant 0 : index
    %10 = vector.load %arg7[%c0_6, %c0_7] : memref<16x32xf32, #tpu.memory_space<vmem>>, vector<16x32xf32>
    tpu.vector_store %arg7[%c0_6, %c0_7], %9 {strides = array<i32>} : memref<16x32xf32, #tpu.memory_space<vmem>>, vector<16x32xf32>,
    %c0_i32_8 = arith.constant 0 : i32
    %11 = arith.cmpi eq, %arg2, %c0_i32_8 : i32
    %12 = arith.extui %11 : i1 to i32
    %c0_i32_9 = arith.constant 0 : i32
    %13 = arith.cmpi ne, %12, %c0_i32_9 : i32
    scf.if %13 {
      %c0_10 = arith.constant 0 : index
      %c0_11 = arith.constant 0 : index
      %14 = vector.load %arg7[%c0_10, %c0_11] : memref<16x32xf32, #tpu.memory_space<vmem>>, vector<16x32xf32>
      %c0_12 = arith.constant 0 : index
      %c0_13 = arith.constant 0 : index
      %15 = vector.load %arg5[%c0_12, %c0_13] : memref<1x32xf32, #tpu.memory_space<vmem>>, vector<1x32xf32>
      %16 = vector.broadcast %15 : vector<1x32xf32> to vector<16x32xf32>
      %17 = arith.addf %14, %16 : vector<16x32xf32>
      %c0_14 = arith.constant 0 : index
      %c0_15 = arith.constant 0 : index
      %18 = vector.load %arg6[%c0_14, %c0_15] : memref<16x32xf32, #tpu.memory_space<vmem>>, vector<16x32xf32>
      tpu.vector_store %arg6[%c0_14, %c0_15], %17 {strides = array<i32>} : memref<16x32xf32, #tpu.memory_space<vmem>>, vector<16x32xf32>,
    } else {
    }
    return
  }
  func.func @transform_0(%arg0: i32, %arg1: i32, %arg2: i32) -> (i32, i32) {
    %c0_i32 = arith.constant 0 : i32
    return %arg0, %arg2 : i32, i32
  }
  func.func @transform_1(%arg0: i32, %arg1: i32, %arg2: i32) -> (i32, i32) {
    %c0_i32 = arith.constant 0 : i32
    return %arg1, %arg2 : i32, i32
  }
  func.func @transform_2(%arg0: i32, %arg1: i32, %arg2: i32) -> (i32, i32) {
    %c0_i32 = arith.constant 0 : i32
    %c0_i32_0 = arith.constant 0 : i32
    return %c0_i32, %arg1 : i32, i32
  }
  func.func @transform_3(%arg0: i32, %arg1: i32, %arg2: i32) -> (i32, i32) {
    %c0_i32 = arith.constant 0 : i32
    return %arg0, %arg1 : i32, i32
  }
}

module attributes {stable_mosaic.version = 11 : i64} {
  func.func @_attn_fused_kernel(%arg0: i32, %arg1: memref<8x8x8xf32, #tpu.memory_space<vmem>>, %arg2: memref<16x8x8xf32, #tpu.memory_space<vmem>>, %arg3: memref<16x8x8xf32, #tpu.memory_space<vmem>>, %arg4: memref<8x8x8xf32, #tpu.memory_space<vmem>>, %arg5: memref<8x8x16xf32, #tpu.memory_space<vmem>>) attributes {dimension_semantics = [#tpu.dimension_semantics<parallel>], iteration_bounds = array<i64: 1>, scalar_prefetch = 0 : i64, scratch_operands = 0 : i64, tpu.core_type = #tpu.core_type<tc>, window_params = [{transform_indices = @transform_0, window_bounds = array<i64: 8, 8, 8>}, {transform_indices = @transform_1, window_bounds = array<i64: 16, 8, 8>}, {transform_indices = @transform_2, window_bounds = array<i64: 16, 8, 8>}, {transform_indices = @transform_3, window_bounds = array<i64: 8, 8, 8>}, {transform_indices = @transform_4, window_bounds = array<i64: 8, 8, 16>}]} {
    %c0 = arith.constant 0 : index
    %c0_0 = arith.constant 0 : index
    %c0_1 = arith.constant 0 : index
    %0 = vector.load %arg1[%c0, %c0_0, %c0_1] : memref<8x8x8xf32, #tpu.memory_space<vmem>>, vector<8x8x8xf32>
    %1 = tpu.transpose %0, [1, 0, 2] : vector<8x8x8xf32> -> vector<8x8x8xf32>
    %c0_2 = arith.constant 0 : index
    %c0_3 = arith.constant 0 : index
    %c0_4 = arith.constant 0 : index
    %2 = vector.load %arg2[%c0_2, %c0_3, %c0_4] : memref<16x8x8xf32, #tpu.memory_space<vmem>>, vector<16x8x8xf32>
    %3 = tpu.transpose %2, [1, 0, 2] : vector<16x8x8xf32> -> vector<8x16x8xf32>
    %c0_5 = arith.constant 0 : index
    %c0_6 = arith.constant 0 : index
    %c0_7 = arith.constant 0 : index
    %4 = vector.load %arg3[%c0_5, %c0_6, %c0_7] : memref<16x8x8xf32, #tpu.memory_space<vmem>>, vector<16x8x8xf32>
    %5 = tpu.transpose %4, [1, 0, 2] : vector<16x8x8xf32> -> vector<8x16x8xf32>
    %6 = arith.truncf %1 : vector<8x8x8xf32> to vector<8x8x8xbf16>
    %7 = arith.truncf %3 : vector<8x16x8xf32> to vector<8x16x8xbf16>
    "tpu.trace_start"() <{level = 10 : i32, message = "bqd,bkd->bqk"}> : () -> ()
    %cst = arith.constant dense<0.000000e+00> : vector<8x8x16xf32>
    %8 = tpu.matmul %6, %7, %cst {dimension_numbers = #tpu.dot_dimension_numbers<[2], [2], [1], [1], [0, 0, 0, 1, 1, 1], [0], [0]>} : vector<8x8x8xbf16>, vector<8x16x8xbf16>, vector<8x8x16xf32> -> vector<8x8x16xf32>
    "tpu.trace_stop"() : () -> ()
    %cst_8 = arith.constant dense<0xFF800000> : vector<8x8xf32>
    %9 = vector.multi_reduction <maximumf>, %8, %cst_8 [2] : vector<8x8x16xf32> to vector<8x8xf32>
    %10 = vector.shape_cast %9 : vector<8x8xf32> to vector<8x8x1xf32>
    %11 = vector.broadcast %10 : vector<8x8x1xf32> to vector<8x8x16xf32>
    %12 = arith.subf %8, %11 : vector<8x8x16xf32>
    %13 = math.exp %12 : vector<8x8x16xf32>
    %cst_9 = arith.constant dense<0.000000e+00> : vector<8x8xf32>
    %14 = vector.multi_reduction <add>, %13, %cst_9 [2] : vector<8x8x16xf32> to vector<8x8xf32>
    %15 = vector.shape_cast %14 : vector<8x8xf32> to vector<8x8x1xf32>
    %16 = vector.broadcast %15 : vector<8x8x1xf32> to vector<8x8x16xf32>
    %17 = arith.divf %13, %16 : vector<8x8x16xf32>
    %18 = arith.truncf %17 : vector<8x8x16xf32> to vector<8x8x16xbf16>
    %19 = arith.truncf %5 : vector<8x16x8xf32> to vector<8x16x8xbf16>
    "tpu.trace_start"() <{level = 10 : i32, message = "bqk,bkd->bqd"}> : () -> ()
    %cst_10 = arith.constant dense<0.000000e+00> : vector<8x8x8xf32>
    %20 = tpu.matmul %18, %19, %cst_10 {dimension_numbers = #tpu.dot_dimension_numbers<[2], [1], [1], [2], [0, 0, 0, 1, 1, 2], [0], [0]>} : vector<8x8x16xbf16>, vector<8x16x8xbf16>, vector<8x8x8xf32> -> vector<8x8x8xf32>
    "tpu.trace_stop"() : () -> ()
    %21 = tpu.transpose %20, [1, 0, 2] : vector<8x8x8xf32> -> vector<8x8x8xf32>
    %c0_11 = arith.constant 0 : index
    %c0_12 = arith.constant 0 : index
    %c0_13 = arith.constant 0 : index
    %22 = vector.load %arg4[%c0_11, %c0_12, %c0_13] : memref<8x8x8xf32, #tpu.memory_space<vmem>>, vector<8x8x8xf32>
    tpu.vector_store %arg4[%c0_11, %c0_12, %c0_13], %21 {strides = array<i32>} : memref<8x8x8xf32, #tpu.memory_space<vmem>>, vector<8x8x8xf32>,
    %c0_14 = arith.constant 0 : index
    %c0_15 = arith.constant 0 : index
    %c0_16 = arith.constant 0 : index
    %23 = vector.load %arg5[%c0_14, %c0_15, %c0_16] : memref<8x8x16xf32, #tpu.memory_space<vmem>>, vector<8x8x16xf32>
    tpu.vector_store %arg5[%c0_14, %c0_15, %c0_16], %17 {strides = array<i32>} : memref<8x8x16xf32, #tpu.memory_space<vmem>>, vector<8x8x16xf32>,
    return
  }
  func.func @transform_0(%arg0: i32) -> (i32, i32, i32) {
    %c0_i32 = arith.constant 0 : i32
    %c0_i32_0 = arith.constant 0 : i32
    %c0_i32_1 = arith.constant 0 : i32
    return %c0_i32, %arg0, %c0_i32_0 : i32, i32, i32
  }
  func.func @transform_1(%arg0: i32) -> (i32, i32, i32) {
    %c0_i32 = arith.constant 0 : i32
    %c0_i32_0 = arith.constant 0 : i32
    %c0_i32_1 = arith.constant 0 : i32
    return %c0_i32, %arg0, %c0_i32_0 : i32, i32, i32
  }
  func.func @transform_2(%arg0: i32) -> (i32, i32, i32) {
    %c0_i32 = arith.constant 0 : i32
    %c0_i32_0 = arith.constant 0 : i32
    %c0_i32_1 = arith.constant 0 : i32
    return %c0_i32, %arg0, %c0_i32_0 : i32, i32, i32
  }
  func.func @transform_3(%arg0: i32) -> (i32, i32, i32) {
    %c0_i32 = arith.constant 0 : i32
    %c0_i32_0 = arith.constant 0 : i32
    %c0_i32_1 = arith.constant 0 : i32
    return %c0_i32, %arg0, %c0_i32_0 : i32, i32, i32
  }
  func.func @transform_4(%arg0: i32) -> (i32, i32, i32) {
    %c0_i32 = arith.constant 0 : i32
    %c0_i32_0 = arith.constant 0 : i32
    %c0_i32_1 = arith.constant 0 : i32
    return %arg0, %c0_i32, %c0_i32_0 : i32, i32, i32
  }
}

module attributes {stable_mosaic.version = 11 : i64} {
  func.func @_linear_kernel(%arg0: i32, %arg1: i32, %arg2: i32, %arg3: memref<16x32xf32, #tpu.memory_space<vmem>>, %arg4: memref<32x32xf32, #tpu.memory_space<vmem>>, %arg5: memref<1x32xf32, #tpu.memory_space<vmem>>, %arg6: memref<16x32xf32, #tpu.memory_space<vmem>>, %arg7: memref<16x32xf32, #tpu.memory_space<vmem>>) attributes {dimension_semantics = [#tpu.dimension_semantics<parallel>, #tpu.dimension_semantics<parallel>, #tpu.dimension_semantics<arbitrary>], iteration_bounds = array<i64: 1, 1, 1>, scalar_prefetch = 0 : i64, scratch_operands = 1 : i64, tpu.core_type = #tpu.core_type<tc>, window_params = [{transform_indices = @transform_0, window_bounds = array<i64: 16, 32>}, {transform_indices = @transform_1, window_bounds = array<i64: 32, 32>}, {transform_indices = @transform_2, window_bounds = array<i64: 1, 32>}, {transform_indices = @transform_3, window_bounds = array<i64: 16, 32>}]} {
    %c0_i32 = arith.constant 0 : i32
    %0 = arith.cmpi eq, %arg2, %c0_i32 : i32
    %1 = arith.extui %0 : i1 to i32
    %c0_i32_0 = arith.constant 0 : i32
    %2 = arith.cmpi ne, %1, %c0_i32_0 : i32
    scf.if %2 {
      %cst_10 = arith.constant 0.000000e+00 : f32
      %14 = vector.broadcast %cst_10 : f32 to vector<16x32xf32>
      %c0_11 = arith.constant 0 : index
      %c0_12 = arith.constant 0 : index
      %15 = vector.load %arg7[%c0_11, %c0_12] : memref<16x32xf32, #tpu.memory_space<vmem>>, vector<16x32xf32>
      tpu.vector_store %arg7[%c0_11, %c0_12], %14 {strides = array<i32>} : memref<16x32xf32, #tpu.memory_space<vmem>>, vector<16x32xf32>,
    } else {
    }
    %c0 = arith.constant 0 : index
    %c0_1 = arith.constant 0 : index
    %3 = vector.load %arg7[%c0, %c0_1] : memref<16x32xf32, #tpu.memory_space<vmem>>, vector<16x32xf32>
    %c0_2 = arith.constant 0 : index
    %c0_3 = arith.constant 0 : index
    %4 = vector.load %arg3[%c0_2, %c0_3] : memref<16x32xf32, #tpu.memory_space<vmem>>, vector<16x32xf32>
    %5 = arith.truncf %4 : vector<16x32xf32> to vector<16x32xbf16>
    %c0_4 = arith.constant 0 : index
    %c0_5 = arith.constant 0 : index
    %6 = vector.load %arg4[%c0_4, %c0_5] : memref<32x32xf32, #tpu.memory_space<vmem>>, vector<32x32xf32>
    %7 = arith.truncf %6 : vector<32x32xf32> to vector<32x32xbf16>
    %cst = arith.constant dense<0.000000e+00> : vector<16x32xf32>
    %8 = tpu.matmul %5, %7, %cst {dimension_numbers = #tpu.dot_dimension_numbers<[1], [1], [0], [0], [0, 0, 1, 0], [], []>} : vector<16x32xbf16>, vector<32x32xbf16>, vector<16x32xf32> -> vector<16x32xf32>
    %9 = arith.addf %3, %8 : vector<16x32xf32>
    %c0_6 = arith.constant 0 : index
    %c0_7 = arith.constant 0 : index
    %10 = vector.load %arg7[%c0_6, %c0_7] : memref<16x32xf32, #tpu.memory_space<vmem>>, vector<16x32xf32>
    tpu.vector_store %arg7[%c0_6, %c0_7], %9 {strides = array<i32>} : memref<16x32xf32, #tpu.memory_space<vmem>>, vector<16x32xf32>,
    %c0_i32_8 = arith.constant 0 : i32
    %11 = arith.cmpi eq, %arg2, %c0_i32_8 : i32
    %12 = arith.extui %11 : i1 to i32
    %c0_i32_9 = arith.constant 0 : i32
    %13 = arith.cmpi ne, %12, %c0_i32_9 : i32
    scf.if %13 {
      %c0_10 = arith.constant 0 : index
      %c0_11 = arith.constant 0 : index
      %14 = vector.load %arg7[%c0_10, %c0_11] : memref<16x32xf32, #tpu.memory_space<vmem>>, vector<16x32xf32>
      %c0_12 = arith.constant 0 : index
      %c0_13 = arith.constant 0 : index
      %15 = vector.load %arg5[%c0_12, %c0_13] : memref<1x32xf32, #tpu.memory_space<vmem>>, vector<1x32xf32>
      %16 = vector.broadcast %15 : vector<1x32xf32> to vector<16x32xf32>
      %17 = arith.addf %14, %16 : vector<16x32xf32>
      %c0_14 = arith.constant 0 : index
      %c0_15 = arith.constant 0 : index
      %18 = vector.load %arg6[%c0_14, %c0_15] : memref<16x32xf32, #tpu.memory_space<vmem>>, vector<16x32xf32>
      tpu.vector_store %arg6[%c0_14, %c0_15], %17 {strides = array<i32>} : memref<16x32xf32, #tpu.memory_space<vmem>>, vector<16x32xf32>,
    } else {
    }
    return
  }
  func.func @transform_0(%arg0: i32, %arg1: i32, %arg2: i32) -> (i32, i32) {
    %c0_i32 = arith.constant 0 : i32
    return %arg0, %arg2 : i32, i32
  }
  func.func @transform_1(%arg0: i32, %arg1: i32, %arg2: i32) -> (i32, i32) {
    %c0_i32 = arith.constant 0 : i32
    return %arg1, %arg2 : i32, i32
  }
  func.func @transform_2(%arg0: i32, %arg1: i32, %arg2: i32) -> (i32, i32) {
    %c0_i32 = arith.constant 0 : i32
    %c0_i32_0 = arith.constant 0 : i32
    return %c0_i32, %arg1 : i32, i32
  }
  func.func @transform_3(%arg0: i32, %arg1: i32, %arg2: i32) -> (i32, i32) {
    %c0_i32 = arith.constant 0 : i32
    return %arg0, %arg1 : i32, i32
  }
}

module attributes {stable_mosaic.version = 11 : i64} {
  func.func @_linear_kernel(%arg0: i32, %arg1: i32, %arg2: i32, %arg3: memref<32x32xf32, #tpu.memory_space<vmem>>, %arg4: memref<32x32xf32, #tpu.memory_space<vmem>>, %arg5: memref<1x32xf32, #tpu.memory_space<vmem>>, %arg6: memref<32x32xf32, #tpu.memory_space<vmem>>, %arg7: memref<32x32xf32, #tpu.memory_space<vmem>>) attributes {dimension_semantics = [#tpu.dimension_semantics<parallel>, #tpu.dimension_semantics<parallel>, #tpu.dimension_semantics<arbitrary>], iteration_bounds = array<i64: 1, 1, 1>, scalar_prefetch = 0 : i64, scratch_operands = 1 : i64, tpu.core_type = #tpu.core_type<tc>, window_params = [{transform_indices = @transform_0, window_bounds = array<i64: 32, 32>}, {transform_indices = @transform_1, window_bounds = array<i64: 32, 32>}, {transform_indices = @transform_2, window_bounds = array<i64: 1, 32>}, {transform_indices = @transform_3, window_bounds = array<i64: 32, 32>}]} {
    %c0_i32 = arith.constant 0 : i32
    %0 = arith.cmpi eq, %arg2, %c0_i32 : i32
    %1 = arith.extui %0 : i1 to i32
    %c0_i32_0 = arith.constant 0 : i32
    %2 = arith.cmpi ne, %1, %c0_i32_0 : i32
    scf.if %2 {
      %cst_10 = arith.constant 0.000000e+00 : f32
      %14 = vector.broadcast %cst_10 : f32 to vector<32x32xf32>
      %c0_11 = arith.constant 0 : index
      %c0_12 = arith.constant 0 : index
      %15 = vector.load %arg7[%c0_11, %c0_12] : memref<32x32xf32, #tpu.memory_space<vmem>>, vector<32x32xf32>
      tpu.vector_store %arg7[%c0_11, %c0_12], %14 {strides = array<i32>} : memref<32x32xf32, #tpu.memory_space<vmem>>, vector<32x32xf32>,
    } else {
    }
    %c0 = arith.constant 0 : index
    %c0_1 = arith.constant 0 : index
    %3 = vector.load %arg7[%c0, %c0_1] : memref<32x32xf32, #tpu.memory_space<vmem>>, vector<32x32xf32>
    %c0_2 = arith.constant 0 : index
    %c0_3 = arith.constant 0 : index
    %4 = vector.load %arg3[%c0_2, %c0_3] : memref<32x32xf32, #tpu.memory_space<vmem>>, vector<32x32xf32>
    %5 = arith.truncf %4 : vector<32x32xf32> to vector<32x32xbf16>
    %c0_4 = arith.constant 0 : index
    %c0_5 = arith.constant 0 : index
    %6 = vector.load %arg4[%c0_4, %c0_5] : memref<32x32xf32, #tpu.memory_space<vmem>>, vector<32x32xf32>
    %7 = arith.truncf %6 : vector<32x32xf32> to vector<32x32xbf16>
    %cst = arith.constant dense<0.000000e+00> : vector<32x32xf32>
    %8 = tpu.matmul %5, %7, %cst {dimension_numbers = #tpu.dot_dimension_numbers<[1], [1], [0], [0], [0, 0, 1, 0], [], []>} : vector<32x32xbf16>, vector<32x32xbf16>, vector<32x32xf32> -> vector<32x32xf32>
    %9 = arith.addf %3, %8 : vector<32x32xf32>
    %c0_6 = arith.constant 0 : index
    %c0_7 = arith.constant 0 : index
    %10 = vector.load %arg7[%c0_6, %c0_7] : memref<32x32xf32, #tpu.memory_space<vmem>>, vector<32x32xf32>
    tpu.vector_store %arg7[%c0_6, %c0_7], %9 {strides = array<i32>} : memref<32x32xf32, #tpu.memory_space<vmem>>, vector<32x32xf32>,
    %c0_i32_8 = arith.constant 0 : i32
    %11 = arith.cmpi eq, %arg2, %c0_i32_8 : i32
    %12 = arith.extui %11 : i1 to i32
    %c0_i32_9 = arith.constant 0 : i32
    %13 = arith.cmpi ne, %12, %c0_i32_9 : i32
    scf.if %13 {
      %c0_10 = arith.constant 0 : index
      %c0_11 = arith.constant 0 : index
      %14 = vector.load %arg7[%c0_10, %c0_11] : memref<32x32xf32, #tpu.memory_space<vmem>>, vector<32x32xf32>
      %c0_12 = arith.constant 0 : index
      %c0_13 = arith.constant 0 : index
      %15 = vector.load %arg5[%c0_12, %c0_13] : memref<1x32xf32, #tpu.memory_space<vmem>>, vector<1x32xf32>
      %16 = vector.broadcast %15 : vector<1x32xf32> to vector<32x32xf32>
      %17 = arith.addf %14, %16 : vector<32x32xf32>
      %c0_14 = arith.constant 0 : index
      %c0_15 = arith.constant 0 : index
      %18 = vector.load %arg6[%c0_14, %c0_15] : memref<32x32xf32, #tpu.memory_space<vmem>>, vector<32x32xf32>
      tpu.vector_store %arg6[%c0_14, %c0_15], %17 {strides = array<i32>} : memref<32x32xf32, #tpu.memory_space<vmem>>, vector<32x32xf32>,
    } else {
    }
    return
  }
  func.func @transform_0(%arg0: i32, %arg1: i32, %arg2: i32) -> (i32, i32) {
    %c0_i32 = arith.constant 0 : i32
    return %arg0, %arg2 : i32, i32
  }
  func.func @transform_1(%arg0: i32, %arg1: i32, %arg2: i32) -> (i32, i32) {
    %c0_i32 = arith.constant 0 : i32
    return %arg1, %arg2 : i32, i32
  }
  func.func @transform_2(%arg0: i32, %arg1: i32, %arg2: i32) -> (i32, i32) {
    %c0_i32 = arith.constant 0 : i32
    %c0_i32_0 = arith.constant 0 : i32
    return %c0_i32, %arg1 : i32, i32
  }
  func.func @transform_3(%arg0: i32, %arg1: i32, %arg2: i32) -> (i32, i32) {
    %c0_i32 = arith.constant 0 : i32
    return %arg0, %arg1 : i32, i32
  }
}

module attributes {stable_mosaic.version = 11 : i64} {
  func.func @_linear_kernel(%arg0: i32, %arg1: i32, %arg2: i32, %arg3: memref<16x32xf32, #tpu.memory_space<vmem>>, %arg4: memref<32x32xf32, #tpu.memory_space<vmem>>, %arg5: memref<1x32xf32, #tpu.memory_space<vmem>>, %arg6: memref<16x32xf32, #tpu.memory_space<vmem>>, %arg7: memref<16x32xf32, #tpu.memory_space<vmem>>) attributes {dimension_semantics = [#tpu.dimension_semantics<parallel>, #tpu.dimension_semantics<parallel>, #tpu.dimension_semantics<arbitrary>], iteration_bounds = array<i64: 1, 1, 1>, scalar_prefetch = 0 : i64, scratch_operands = 1 : i64, tpu.core_type = #tpu.core_type<tc>, window_params = [{transform_indices = @transform_0, window_bounds = array<i64: 16, 32>}, {transform_indices = @transform_1, window_bounds = array<i64: 32, 32>}, {transform_indices = @transform_2, window_bounds = array<i64: 1, 32>}, {transform_indices = @transform_3, window_bounds = array<i64: 16, 32>}]} {
    %c0_i32 = arith.constant 0 : i32
    %0 = arith.cmpi eq, %arg2, %c0_i32 : i32
    %1 = arith.extui %0 : i1 to i32
    %c0_i32_0 = arith.constant 0 : i32
    %2 = arith.cmpi ne, %1, %c0_i32_0 : i32
    scf.if %2 {
      %cst_10 = arith.constant 0.000000e+00 : f32
      %14 = vector.broadcast %cst_10 : f32 to vector<16x32xf32>
      %c0_11 = arith.constant 0 : index
      %c0_12 = arith.constant 0 : index
      %15 = vector.load %arg7[%c0_11, %c0_12] : memref<16x32xf32, #tpu.memory_space<vmem>>, vector<16x32xf32>
      tpu.vector_store %arg7[%c0_11, %c0_12], %14 {strides = array<i32>} : memref<16x32xf32, #tpu.memory_space<vmem>>, vector<16x32xf32>,
    } else {
    }
    %c0 = arith.constant 0 : index
    %c0_1 = arith.constant 0 : index
    %3 = vector.load %arg7[%c0, %c0_1] : memref<16x32xf32, #tpu.memory_space<vmem>>, vector<16x32xf32>
    %c0_2 = arith.constant 0 : index
    %c0_3 = arith.constant 0 : index
    %4 = vector.load %arg3[%c0_2, %c0_3] : memref<16x32xf32, #tpu.memory_space<vmem>>, vector<16x32xf32>
    %5 = arith.truncf %4 : vector<16x32xf32> to vector<16x32xbf16>
    %c0_4 = arith.constant 0 : index
    %c0_5 = arith.constant 0 : index
    %6 = vector.load %arg4[%c0_4, %c0_5] : memref<32x32xf32, #tpu.memory_space<vmem>>, vector<32x32xf32>
    %7 = arith.truncf %6 : vector<32x32xf32> to vector<32x32xbf16>
    %cst = arith.constant dense<0.000000e+00> : vector<16x32xf32>
    %8 = tpu.matmul %5, %7, %cst {dimension_numbers = #tpu.dot_dimension_numbers<[1], [1], [0], [0], [0, 0, 1, 0], [], []>} : vector<16x32xbf16>, vector<32x32xbf16>, vector<16x32xf32> -> vector<16x32xf32>
    %9 = arith.addf %3, %8 : vector<16x32xf32>
    %c0_6 = arith.constant 0 : index
    %c0_7 = arith.constant 0 : index
    %10 = vector.load %arg7[%c0_6, %c0_7] : memref<16x32xf32, #tpu.memory_space<vmem>>, vector<16x32xf32>
    tpu.vector_store %arg7[%c0_6, %c0_7], %9 {strides = array<i32>} : memref<16x32xf32, #tpu.memory_space<vmem>>, vector<16x32xf32>,
    %c0_i32_8 = arith.constant 0 : i32
    %11 = arith.cmpi eq, %arg2, %c0_i32_8 : i32
    %12 = arith.extui %11 : i1 to i32
    %c0_i32_9 = arith.constant 0 : i32
    %13 = arith.cmpi ne, %12, %c0_i32_9 : i32
    scf.if %13 {
      %c0_10 = arith.constant 0 : index
      %c0_11 = arith.constant 0 : index
      %14 = vector.load %arg7[%c0_10, %c0_11] : memref<16x32xf32, #tpu.memory_space<vmem>>, vector<16x32xf32>
      %c0_12 = arith.constant 0 : index
      %c0_13 = arith.constant 0 : index
      %15 = vector.load %arg5[%c0_12, %c0_13] : memref<1x32xf32, #tpu.memory_space<vmem>>, vector<1x32xf32>
      %16 = vector.broadcast %15 : vector<1x32xf32> to vector<16x32xf32>
      %17 = arith.addf %14, %16 : vector<16x32xf32>
      %c0_14 = arith.constant 0 : index
      %c0_15 = arith.constant 0 : index
      %18 = vector.load %arg6[%c0_14, %c0_15] : memref<16x32xf32, #tpu.memory_space<vmem>>, vector<16x32xf32>
      tpu.vector_store %arg6[%c0_14, %c0_15], %17 {strides = array<i32>} : memref<16x32xf32, #tpu.memory_space<vmem>>, vector<16x32xf32>,
    } else {
    }
    return
  }
  func.func @transform_0(%arg0: i32, %arg1: i32, %arg2: i32) -> (i32, i32) {
    %c0_i32 = arith.constant 0 : i32
    return %arg0, %arg2 : i32, i32
  }
  func.func @transform_1(%arg0: i32, %arg1: i32, %arg2: i32) -> (i32, i32) {
    %c0_i32 = arith.constant 0 : i32
    return %arg1, %arg2 : i32, i32
  }
  func.func @transform_2(%arg0: i32, %arg1: i32, %arg2: i32) -> (i32, i32) {
    %c0_i32 = arith.constant 0 : i32
    %c0_i32_0 = arith.constant 0 : i32
    return %c0_i32, %arg1 : i32, i32
  }
  func.func @transform_3(%arg0: i32, %arg1: i32, %arg2: i32) -> (i32, i32) {
    %c0_i32 = arith.constant 0 : i32
    return %arg0, %arg1 : i32, i32
  }
}

module attributes {stable_mosaic.version = 11 : i64} {
  func.func @_attn_headmajor_kernel(%arg0: i32, %arg1: memref<8x8x8xf32, #tpu.memory_space<vmem>>, %arg2: memref<8x16x8xf32, #tpu.memory_space<vmem>>, %arg3: memref<8x16x8xf32, #tpu.memory_space<vmem>>, %arg4: memref<8x8x8xf32, #tpu.memory_space<vmem>>, %arg5: memref<8x8x16xf32, #tpu.memory_space<vmem>>) attributes {dimension_semantics = [#tpu.dimension_semantics<parallel>], iteration_bounds = array<i64: 1>, scalar_prefetch = 0 : i64, scratch_operands = 0 : i64, tpu.core_type = #tpu.core_type<tc>, window_params = [{transform_indices = @transform_0, window_bounds = array<i64: 8, 8, 8>}, {transform_indices = @transform_1, window_bounds = array<i64: 8, 16, 8>}, {transform_indices = @transform_2, window_bounds = array<i64: 8, 16, 8>}, {transform_indices = @transform_3, window_bounds = array<i64: 8, 8, 8>}, {transform_indices = @transform_4, window_bounds = array<i64: 8, 8, 16>}]} {
    %c0 = arith.constant 0 : index
    %c0_0 = arith.constant 0 : index
    %c0_1 = arith.constant 0 : index
    %0 = vector.load %arg1[%c0, %c0_0, %c0_1] : memref<8x8x8xf32, #tpu.memory_space<vmem>>, vector<8x8x8xf32>
    %c0_2 = arith.constant 0 : index
    %c0_3 = arith.constant 0 : index
    %c0_4 = arith.constant 0 : index
    %1 = vector.load %arg2[%c0_2, %c0_3, %c0_4] : memref<8x16x8xf32, #tpu.memory_space<vmem>>, vector<8x16x8xf32>
    %c0_5 = arith.constant 0 : index
    %c0_6 = arith.constant 0 : index
    %c0_7 = arith.constant 0 : index
    %2 = vector.load %arg3[%c0_5, %c0_6, %c0_7] : memref<8x16x8xf32, #tpu.memory_space<vmem>>, vector<8x16x8xf32>
    %3 = arith.truncf %0 : vector<8x8x8xf32> to vector<8x8x8xbf16>
    %4 = arith.truncf %1 : vector<8x16x8xf32> to vector<8x16x8xbf16>
    "tpu.trace_start"() <{level = 10 : i32, message = "bqd,bkd->bqk"}> : () -> ()
    %cst = arith.constant dense<0.000000e+00> : vector<8x8x16xf32>
    %5 = tpu.matmul %3, %4, %cst {dimension_numbers = #tpu.dot_dimension_numbers<[2], [2], [1], [1], [0, 0, 0, 1, 1, 1], [0], [0]>} : vector<8x8x8xbf16>, vector<8x16x8xbf16>, vector<8x8x16xf32> -> vector<8x8x16xf32>
    "tpu.trace_stop"() : () -> ()
    %cst_8 = arith.constant dense<0xFF800000> : vector<8x8xf32>
    %6 = vector.multi_reduction <maximumf>, %5, %cst_8 [2] : vector<8x8x16xf32> to vector<8x8xf32>
    %7 = vector.shape_cast %6 : vector<8x8xf32> to vector<8x8x1xf32>
    %8 = vector.broadcast %7 : vector<8x8x1xf32> to vector<8x8x16xf32>
    %9 = arith.subf %5, %8 : vector<8x8x16xf32>
    %10 = math.exp %9 : vector<8x8x16xf32>
    %cst_9 = arith.constant dense<0.000000e+00> : vector<8x8xf32>
    %11 = vector.multi_reduction <add>, %10, %cst_9 [2] : vector<8x8x16xf32> to vector<8x8xf32>
    %12 = vector.shape_cast %11 : vector<8x8xf32> to vector<8x8x1xf32>
    %13 = vector.broadcast %12 : vector<8x8x1xf32> to vector<8x8x16xf32>
    %14 = arith.divf %10, %13 : vector<8x8x16xf32>
    %15 = arith.truncf %14 : vector<8x8x16xf32> to vector<8x8x16xbf16>
    %16 = arith.truncf %2 : vector<8x16x8xf32> to vector<8x16x8xbf16>
    "tpu.trace_start"() <{level = 10 : i32, message = "bqk,bkd->bqd"}> : () -> ()
    %cst_10 = arith.constant dense<0.000000e+00> : vector<8x8x8xf32>
    %17 = tpu.matmul %15, %16, %cst_10 {dimension_numbers = #tpu.dot_dimension_numbers<[2], [1], [1], [2], [0, 0, 0, 1, 1, 2], [0], [0]>} : vector<8x8x16xbf16>, vector<8x16x8xbf16>, vector<8x8x8xf32> -> vector<8x8x8xf32>
    "tpu.trace_stop"() : () -> ()
    %c0_11 = arith.constant 0 : index
    %c0_12 = arith.constant 0 : index
    %c0_13 = arith.constant 0 : index
    %18 = vector.load %arg4[%c0_11, %c0_12, %c0_13] : memref<8x8x8xf32, #tpu.memory_space<vmem>>, vector<8x8x8xf32>
    tpu.vector_store %arg4[%c0_11, %c0_12, %c0_13], %17 {strides = array<i32>} : memref<8x8x8xf32, #tpu.memory_space<vmem>>, vector<8x8x8xf32>,
    %c0_14 = arith.constant 0 : index
    %c0_15 = arith.constant 0 : index
    %c0_16 = arith.constant 0 : index
    %19 = vector.load %arg5[%c0_14, %c0_15, %c0_16] : memref<8x8x16xf32, #tpu.memory_space<vmem>>, vector<8x8x16xf32>
    tpu.vector_store %arg5[%c0_14, %c0_15, %c0_16], %14 {strides = array<i32>} : memref<8x8x16xf32, #tpu.memory_space<vmem>>, vector<8x8x16xf32>,
    return
  }
  func.func @transform_0(%arg0: i32) -> (i32, i32, i32) {
    %c0_i32 = arith.constant 0 : i32
    %c0_i32_0 = arith.constant 0 : i32
    %c0_i32_1 = arith.constant 0 : i32
    return %arg0, %c0_i32, %c0_i32_0 : i32, i32, i32
  }
  func.func @transform_1(%arg0: i32) -> (i32, i32, i32) {
    %c0_i32 = arith.constant 0 : i32
    %c0_i32_0 = arith.constant 0 : i32
    %c0_i32_1 = arith.constant 0 : i32
    return %arg0, %c0_i32, %c0_i32_0 : i32, i32, i32
  }
  func.func @transform_2(%arg0: i32) -> (i32, i32, i32) {
    %c0_i32 = arith.constant 0 : i32
    %c0_i32_0 = arith.constant 0 : i32
    %c0_i32_1 = arith.constant 0 : i32
    return %arg0, %c0_i32, %c0_i32_0 : i32, i32, i32
  }
  func.func @transform_3(%arg0: i32) -> (i32, i32, i32) {
    %c0_i32 = arith.constant 0 : i32
    %c0_i32_0 = arith.constant 0 : i32
    %c0_i32_1 = arith.constant 0 : i32
    return %arg0, %c0_i32, %c0_i32_0 : i32, i32, i32
  }
  func.func @transform_4(%arg0: i32) -> (i32, i32, i32) {
    %c0_i32 = arith.constant 0 : i32
    %c0_i32_0 = arith.constant 0 : i32
    %c0_i32_1 = arith.constant 0 : i32
    return %arg0, %c0_i32, %c0_i32_0 : i32, i32, i32
  }
}

module attributes {stable_mosaic.version = 11 : i64} {
  func.func @_linear_kernel(%arg0: i32, %arg1: i32, %arg2: i32, %arg3: memref<16x32xf32, #tpu.memory_space<vmem>>, %arg4: memref<32x32xf32, #tpu.memory_space<vmem>>, %arg5: memref<1x32xf32, #tpu.memory_space<vmem>>, %arg6: memref<16x32xf32, #tpu.memory_space<vmem>>, %arg7: memref<16x32xf32, #tpu.memory_space<vmem>>) attributes {dimension_semantics = [#tpu.dimension_semantics<parallel>, #tpu.dimension_semantics<parallel>, #tpu.dimension_semantics<arbitrary>], iteration_bounds = array<i64: 1, 1, 1>, scalar_prefetch = 0 : i64, scratch_operands = 1 : i64, tpu.core_type = #tpu.core_type<tc>, window_params = [{transform_indices = @transform_0, window_bounds = array<i64: 16, 32>}, {transform_indices = @transform_1, window_bounds = array<i64: 32, 32>}, {transform_indices = @transform_2, window_bounds = array<i64: 1, 32>}, {transform_indices = @transform_3, window_bounds = array<i64: 16, 32>}]} {
    %c0_i32 = arith.constant 0 : i32
    %0 = arith.cmpi eq, %arg2, %c0_i32 : i32
    %1 = arith.extui %0 : i1 to i32
    %c0_i32_0 = arith.constant 0 : i32
    %2 = arith.cmpi ne, %1, %c0_i32_0 : i32
    scf.if %2 {
      %cst_10 = arith.constant 0.000000e+00 : f32
      %14 = vector.broadcast %cst_10 : f32 to vector<16x32xf32>
      %c0_11 = arith.constant 0 : index
      %c0_12 = arith.constant 0 : index
      %15 = vector.load %arg7[%c0_11, %c0_12] : memref<16x32xf32, #tpu.memory_space<vmem>>, vector<16x32xf32>
      tpu.vector_store %arg7[%c0_11, %c0_12], %14 {strides = array<i32>} : memref<16x32xf32, #tpu.memory_space<vmem>>, vector<16x32xf32>,
    } else {
    }
    %c0 = arith.constant 0 : index
    %c0_1 = arith.constant 0 : index
    %3 = vector.load %arg7[%c0, %c0_1] : memref<16x32xf32, #tpu.memory_space<vmem>>, vector<16x32xf32>
    %c0_2 = arith.constant 0 : index
    %c0_3 = arith.constant 0 : index
    %4 = vector.load %arg3[%c0_2, %c0_3] : memref<16x32xf32, #tpu.memory_space<vmem>>, vector<16x32xf32>
    %5 = arith.truncf %4 : vector<16x32xf32> to vector<16x32xbf16>
    %c0_4 = arith.constant 0 : index
    %c0_5 = arith.constant 0 : index
    %6 = vector.load %arg4[%c0_4, %c0_5] : memref<32x32xf32, #tpu.memory_space<vmem>>, vector<32x32xf32>
    %7 = arith.truncf %6 : vector<32x32xf32> to vector<32x32xbf16>
    %cst = arith.constant dense<0.000000e+00> : vector<16x32xf32>
    %8 = tpu.matmul %5, %7, %cst {dimension_numbers = #tpu.dot_dimension_numbers<[1], [1], [0], [0], [0, 0, 1, 0], [], []>} : vector<16x32xbf16>, vector<32x32xbf16>, vector<16x32xf32> -> vector<16x32xf32>
    %9 = arith.addf %3, %8 : vector<16x32xf32>
    %c0_6 = arith.constant 0 : index
    %c0_7 = arith.constant 0 : index
    %10 = vector.load %arg7[%c0_6, %c0_7] : memref<16x32xf32, #tpu.memory_space<vmem>>, vector<16x32xf32>
    tpu.vector_store %arg7[%c0_6, %c0_7], %9 {strides = array<i32>} : memref<16x32xf32, #tpu.memory_space<vmem>>, vector<16x32xf32>,
    %c0_i32_8 = arith.constant 0 : i32
    %11 = arith.cmpi eq, %arg2, %c0_i32_8 : i32
    %12 = arith.extui %11 : i1 to i32
    %c0_i32_9 = arith.constant 0 : i32
    %13 = arith.cmpi ne, %12, %c0_i32_9 : i32
    scf.if %13 {
      %c0_10 = arith.constant 0 : index
      %c0_11 = arith.constant 0 : index
      %14 = vector.load %arg7[%c0_10, %c0_11] : memref<16x32xf32, #tpu.memory_space<vmem>>, vector<16x32xf32>
      %c0_12 = arith.constant 0 : index
      %c0_13 = arith.constant 0 : index
      %15 = vector.load %arg5[%c0_12, %c0_13] : memref<1x32xf32, #tpu.memory_space<vmem>>, vector<1x32xf32>
      %16 = vector.broadcast %15 : vector<1x32xf32> to vector<16x32xf32>
      %17 = arith.addf %14, %16 : vector<16x32xf32>
      %c0_14 = arith.constant 0 : index
      %c0_15 = arith.constant 0 : index
      %18 = vector.load %arg6[%c0_14, %c0_15] : memref<16x32xf32, #tpu.memory_space<vmem>>, vector<16x32xf32>
      tpu.vector_store %arg6[%c0_14, %c0_15], %17 {strides = array<i32>} : memref<16x32xf32, #tpu.memory_space<vmem>>, vector<16x32xf32>,
    } else {
    }
    return
  }
  func.func @transform_0(%arg0: i32, %arg1: i32, %arg2: i32) -> (i32, i32) {
    %c0_i32 = arith.constant 0 : i32
    return %arg0, %arg2 : i32, i32
  }
  func.func @transform_1(%arg0: i32, %arg1: i32, %arg2: i32) -> (i32, i32) {
    %c0_i32 = arith.constant 0 : i32
    return %arg1, %arg2 : i32, i32
  }
  func.func @transform_2(%arg0: i32, %arg1: i32, %arg2: i32) -> (i32, i32) {
    %c0_i32 = arith.constant 0 : i32
    %c0_i32_0 = arith.constant 0 : i32
    return %c0_i32, %arg1 : i32, i32
  }
  func.func @transform_3(%arg0: i32, %arg1: i32, %arg2: i32) -> (i32, i32) {
    %c0_i32 = arith.constant 0 : i32
    return %arg0, %arg1 : i32, i32
  }
}

</mosaic_0001>

<bundles_post_ra>
// kernel: _mha_forward.7
= control target key start
LH: loop header
LB: loop body
LE: loop exit
PB: predicated region body
PF: predicated region fallthrough
CT: control target
= control target key end

     0   :  { %vm19_vm0 = vcmask 261120   ;;  %v154_v3 = vmov 0.0   ;;  %s232_s1 = inlined_call_operand.vmem [shape: f32[32,32], index: 1, kind: input, shape index: {}]   ;;  %s233_s0 = inlined_call_operand.vmem [shape: f32[32,32], index: 0, kind: input, shape index: {}]   ;;  %s234_s2 = inlined_call_operand.vmem [shape: f32[1,32], index: 2, kind: input, shape index: {}]   ;;  %s235_s3 = inlined_call_operand.vmem [shape: f32[32,32], index: 3, kind: output, shape index: {}]  }
   0x1   :  { %v34_v0 = vld [vmem:[%s232_s1] sm:$0xff]  ;;  %v35_v1 = vld [vmem:[%s232_s1 + $0x8] sm:$0xff]  ;;  %v36_v2 = vld [vmem:[%s232_s1 + $0x10] sm:$0xff]  ;;  %22 = vst.msk [vmem:[#allocation2 + $0x10] sm:$0xff] %vm19_vm0, %v154_v3 }
   0x2   :  { %20 = vst.msk [vmem:[#allocation2] sm:$0xff] %vm19_vm0, %v154_v3  ;;  %21 = vst.msk [vmem:[#allocation2 + $0x8] sm:$0xff] %vm19_vm0, %v154_v3  ;;  %v38_v4 = vpack.c.bf16 %v35_v1, %v34_v0  ;;  %v37_v5 = vld [vmem:[%s232_s1 + $0x18] sm:$0xff]  ;;  %v28_v6 = vld [vmem:[%s233_s0] sm:$0xff] }
   0x3   :  { %23 = vst.msk [vmem:[#allocation2 + $0x18] sm:$0xff] %vm19_vm0, %v154_v3  ;;  %v29_v7 = vld [vmem:[%s233_s0 + $0x8] sm:$0xff]  ;;  %v39_v8 = vpack.c.bf16 %v37_v5, %v36_v2  ;;  %v30_v12 = vld [vmem:[%s233_s0 + $0x10] sm:$0xff]  ;;  %v31_v13 = vld [vmem:[%s233_s0 + $0x18] sm:$0xff] }
   0x4   :  { %v32_v9 = vpack.c.bf16 %v29_v7, %v28_v6  ;;  %151 = vmatprep.subr.msk.bf16.mxu0 %vm19_vm0, %v38_v4  ;;  %v48_v10 = vsel %vm19_vm0, %v38_v4, 0  ;;  %v33_v14 = vpack.c.bf16 %v31_v13, %v30_v12  ;;  %v138_v27 = vld [vmem:[%s234_s2] ss:$0 sm:$0xff] }
   0x5   :  { %144 = vmatpush3.bf16.xpose.msra.mxu0 %v48_v10  ;;  %v51_v11 = vsel %vm19_vm0, %v39_v8, 0 }
   0x6   :  { %147 = vmatprep.mubr.msk.bf16.mxu0 %vm19_vm0, %v32_v9  ;;  %152 = vmatprep.subr.msk.bf16.mxu0 %vm19_vm0, %v39_v8 }
   0x8   :  { %v26_v15 = vld [vmem:[#allocation2 + $0x10] sm:$0xff] }
   0x9   :  { %v24_v16 = vld [vmem:[#allocation2] sm:$0xff]  ;;  %v25_v21 = vld [vmem:[#allocation2 + $0x8] sm:$0xff] }
   0xa   :  { %v27_v18 = vld [vmem:[#allocation2 + $0x18] sm:$0xff] }
   0xd   :  { %146 = vmatpush3.bf16.xpose.msra.mxu0 %v51_v11 }
  0x14   :  { %148 = vmatmul.mubr.msk.bf16.vlgmr.msra.gmra.mrb[0].mxu0 %vm19_vm0, %v33_v14 }
  0xe7   :  { %v149_v17 = vpop.f32.mrb[0].mxu0 }
  0xe8   :  { %v104_v19 = vadd.f32 %v149_v17, %v26_v15  ;;  %v87_v20 = vpop.f32.mrb[1].mxu0 }
  0xe9   :  { %v102_v22 = vadd.f32 %v87_v20, %v24_v16  ;;  %v150_v23 = vpop.f32.mrb[2].mxu0 }
  0xea   :  { %108 = vst.msk [vmem:[#allocation2 + $0x10] sm:$0xff] %vm19_vm0, %v104_v19  ;;  %v105_v24 = vadd.f32 %v150_v23, %v27_v18  ;;  %v90_v25 = vpop.f32.mrb[3].mxu0 }
  0xeb   :  { %106 = vst.msk [vmem:[#allocation2] sm:$0xff] %vm19_vm0, %v102_v22  ;;  %v103_v26 = vadd.f32 %v90_v25, %v25_v21 }
  0xec   :  { %109 = vst.msk [vmem:[#allocation2 + $0x18] sm:$0xff] %vm19_vm0, %v105_v24 }
  0xed   :  { %107 = vst.msk [vmem:[#allocation2 + $0x8] sm:$0xff] %vm19_vm0, %v103_v26 }
  0xf1   :  { %v115_v28 = vld [vmem:[#allocation2 + $0x10] sm:$0xff] }
  0xf2   :  { %v126_v29 = vadd.f32 %v138_v27, %v115_v28  ;;  %v113_v30 = vld [vmem:[#allocation2] sm:$0xff] }
  0xf3   :  { %v124_v31 = vadd.f32 %v138_v27, %v113_v30  ;;  %v116_v32 = vld [vmem:[#allocation2 + $0x18] sm:$0xff] }
  0xf4   :  { %130 = vst.msk [vmem:[%s235_s3 + $0x10] sm:$0xff] %vm19_vm0, %v126_v29  ;;  %v127_v33 = vadd.f32 %v138_v27, %v116_v32  ;;  %v114_v34 = vld [vmem:[#allocation2 + $0x8] sm:$0xff] }
  0xf5   :  { %128 = vst.msk [vmem:[%s235_s3] sm:$0xff] %vm19_vm0, %v124_v31  ;;  %v125_v35 = vadd.f32 %v138_v27, %v114_v34 }
  0xf6   :  { %131 = vst.msk [vmem:[%s235_s3 + $0x18] sm:$0xff] %vm19_vm0, %v127_v33 }
  0xf7   :  { %129 = vst.msk [vmem:[%s235_s3 + $0x8] sm:$0xff] %vm19_vm0, %v125_v35 }

// kernel: _mha_forward.5
= control target key start
LH: loop header
LB: loop body
LE: loop exit
PB: predicated region body
PF: predicated region fallthrough
CT: control target
= control target key end

     0   :  { %vm19_vm0 = vcmask 261120   ;;  %v123_v0 = vmov 0.0   ;;  %vm124_vm1 = vmmov 0   ;;  %s181_s1 = inlined_call_operand.vmem [shape: f32[32,32], index: 1, kind: input, shape index: {}]   ;;  %s182_s0 = inlined_call_operand.vmem [shape: f32[16,32], index: 0, kind: input, shape index: {}]   ;;  %s183_s2 = inlined_call_operand.vmem [shape: f32[1,32], index: 2, kind: input, shape index: {}]   ;;  %s184_s3 = inlined_call_operand.vmem [shape: f32[16,32], index: 3, kind: output, shape index: {}]  }
   0x1   :  { %113 = vmatprep.subr.bf16.mxu0 %v123_v0  ;;  %v27_v1 = vld [vmem:[%s181_s1] sm:$0xff]  ;;  %v28_v2 = vld [vmem:[%s181_s1 + $0x8] sm:$0xff]  ;;  %20 = vst.msk [vmem:[#allocation2] sm:$0xff] %vm19_vm0, %v123_v0  ;;  %21 = vst.msk [vmem:[#allocation2 + $0x8] sm:$0xff] %vm19_vm0, %v123_v0  ;;  %117 = vmatprep.mubr.msk.bf16.mxu0 %vm124_vm1, %v123_v0 }
   0x2   :  { %v31_v3 = vpack.c.bf16 %v28_v2, %v27_v1  ;;  %v29_v4 = vld [vmem:[%s181_s1 + $0x10] sm:$0xff]  ;;  %v30_v5 = vld [vmem:[%s181_s1 + $0x18] sm:$0xff]  ;;  %v24_v9 = vld [vmem:[%s182_s0] sm:$0xff] }
   0x3   :  { %v32_v7 = vpack.c.bf16 %v30_v5, %v29_v4  ;;  %v25_v10 = vld [vmem:[%s182_s0 + $0x8] sm:$0xff]  ;;  %v109_v20 = vld [vmem:[%s183_s2] ss:$0 sm:$0xff] }
   0x4   :  { %v38_v6 = vsel %vm19_vm0, %v31_v3, 0  ;;  %v26_v11 = vpack.c.bf16 %v25_v10, %v24_v9 }
   0x5   :  { %114 = vmatpush3.bf16.xpose.msra.mxu0 %v38_v6  ;;  %v41_v8 = vsel %vm19_vm0, %v32_v7, 0 }
   0x6   :  { %115 = vmatprep.subr.bf16.mxu0 %v123_v0 }
   0x8   :  { %v22_v12 = vld [vmem:[#allocation2] sm:$0xff]  ;;  %v23_v14 = vld [vmem:[#allocation2 + $0x8] sm:$0xff] }
   0xd   :  { %116 = vmatpush3.bf16.xpose.msra.mxu0 %v41_v8 }
  0x14   :  { %118 = vmatmul.mubr.msk.bf16.vlgmr.msra.gmra.mrb[0].mxu0 %vm19_vm0, %v26_v11 }
  0xe7   :  { %v77_v13 = vpop.f32.mrb[0].mxu0 }
  0xe8   :  { %v84_v15 = vadd.f32 %v77_v13, %v22_v12  ;;  %v119_v16 = vpop.f32.mrb[1].mxu0 }
  0xe9   :  { %v80_v17 = vpop.f32.mrb[2].mxu0 }
  0xea   :  { %86 = vst.msk [vmem:[#allocation2] sm:$0xff] %vm19_vm0, %v84_v15  ;;  %v85_v18 = vadd.f32 %v80_v17, %v23_v14  ;;  %v120_v19 = vpop.f32.mrb[3].mxu0 }
  0xec   :  { %87 = vst.msk [vmem:[#allocation2 + $0x8] sm:$0xff] %vm19_vm0, %v85_v18 }
  0xf1   :  { %v91_v21 = vld [vmem:[#allocation2] sm:$0xff] }
  0xf2   :  { %v100_v22 = vadd.f32 %v109_v20, %v91_v21 }
  0xf3   :  { %v92_v23 = vld [vmem:[#allocation2 + $0x8] sm:$0xff] }
  0xf4   :  { %102 = vst.msk [vmem:[%s184_s3] sm:$0xff] %vm19_vm0, %v100_v22  ;;  %v101_v24 = vadd.f32 %v109_v20, %v92_v23 }
  0xf6   :  { %103 = vst.msk [vmem:[%s184_s3 + $0x8] sm:$0xff] %vm19_vm0, %v101_v24 }

// kernel: _mha_forward.9
= control target key start
LH: loop header
LB: loop body
LE: loop exit
PB: predicated region body
PF: predicated region fallthrough
CT: control target
= control target key end

     0   :  { %vm20_vm0 = vcmask 261120   ;;  %v163_v2 = vmov 0.0   ;;  %vm164_vm1 = vmmov 0   ;;  %s230_s0 = inlined_call_operand.vmem [shape: f32[16,32], index: 0, kind: input, shape index: {}]   ;;  %s231_s1 = inlined_call_operand.vmem [shape: f32[32,32], index: 1, kind: input, shape index: {}]   ;;  %s232_s2 = inlined_call_operand.vmem [shape: f32[1,32], index: 2, kind: input, shape index: {}]   ;;  %s233_s3 = inlined_call_operand.hbm [shape: f32[16,32], index: 3, kind: output, shape index: {}]  }
   0x1   :  { %v28_v0 = vld [vmem:[%s231_s1] sm:$0xff]  ;;  %v29_v1 = vld [vmem:[%s231_s1 + $0x8] sm:$0xff]  ;;  %126 = vmatprep.subr.bf16.mxu0 %v163_v2  ;;  %21 = vst.msk [vmem:[#allocation2] sm:$0xff] %vm20_vm0, %v163_v2  ;;  %22 = vst.msk [vmem:[#allocation2 + $0x8] sm:$0xff] %vm20_vm0, %v163_v2  ;;  %130 = vmatprep.mubr.msk.bf16.mxu0 %vm164_vm1, %v163_v2 }
   0x2   :  { %v32_v3 = vpack.c.bf16 %v29_v1, %v28_v0  ;;  %v30_v4 = vld [vmem:[%s231_s1 + $0x10] sm:$0xff]  ;;  %v31_v5 = vld [vmem:[%s231_s1 + $0x18] sm:$0xff] }
   0x3   :  { %8 = vsyncpa [#allocation4], 0  ;;  %v33_v7 = vpack.c.bf16 %v31_v5, %v30_v4  ;;  %v25_v9 = vld [vmem:[%s230_s0] sm:$0xff]  ;;  %v26_v10 = vld [vmem:[%s230_s0 + $0x8] sm:$0xff]  ;;  %s165_s0 = smov [#allocation3]  }
   0x4   :  { %v39_v6 = vsel %vm20_vm0, %v32_v3, 0  ;;  %v27_v11 = vpack.c.bf16 %v26_v10, %v25_v9  ;;  %v122_v20 = vld [vmem:[%s232_s2] ss:$0 sm:$0xff]  ;;  %s110_s25 = sshll.u32 %s165_s0, 4  ;;  %s111_s25 = int_to_ptr.vmem [resolvable:$true] %s110_s25 }
   0x5   :  { %127 = vmatpush3.bf16.xpose.msra.mxu0 %v39_v6  ;;  %v42_v8 = vsel %vm20_vm0, %v33_v7, 0  ;;  %s139_s26 = scalar_lea.vmem %s111_s25, 256  ;;  %p144_p1 = scmp.lt.s32.totalorder %s111_s25, %s111_s25 }
   0x6   :  { %128 = vmatprep.subr.bf16.mxu0 %v163_v2  ;;  %p140_p0 = scmp.ne.s32.totalorder %s111_s25, %s139_s26  ;;  %p145_p2 = scmp.lt.s32.totalorder %s139_s26, %s139_s26 }
   0x8   :  { %v23_v12 = vld [vmem:[#allocation2] sm:$0xff]  ;;  %v24_v14 = vld [vmem:[#allocation2 + $0x8] sm:$0xff]  ;;  %p146_p3 = por %p145_p2, %p144_p1 }
   0xa   :  { %p147_p4 = pnand %p146_p3, %p140_p0 }
   0xd   :  { %129 = vmatpush3.bf16.xpose.msra.mxu0 %v42_v8 }
  0x14   :  { %131 = vmatmul.mubr.msk.bf16.vlgmr.msra.gmra.mrb[0].mxu0 %vm20_vm0, %v27_v11 }
  0xe7   :  { %v78_v13 = vpop.f32.mrb[0].mxu0 }
  0xe8   :  { %v85_v15 = vadd.f32 %v78_v13, %v23_v12  ;;  %v132_v16 = vpop.f32.mrb[1].mxu0 }
  0xe9   :  { %v81_v17 = vpop.f32.mrb[2].mxu0 }
  0xea   :  { %87 = vst.msk [vmem:[#allocation2] sm:$0xff] %vm20_vm0, %v85_v15  ;;  %v86_v18 = vadd.f32 %v81_v17, %v24_v14  ;;  %v133_v19 = vpop.f32.mrb[3].mxu0 }
  0xec   :  { %88 = vst.msk [vmem:[#allocation2 + $0x8] sm:$0xff] %vm20_vm0, %v86_v18 }
  0xf1   :  { %v92_v21 = vld [vmem:[#allocation2] sm:$0xff] }
  0xf2   :  { %v101_v22 = vadd.f32 %v122_v20, %v92_v21 }
  0xf3   :  { %v93_v23 = vld [vmem:[#allocation2 + $0x8] sm:$0xff] }
  0xf4   :  { %v102_v24 = vadd.f32 %v122_v20, %v93_v23  ;;  %103 = vst.msk [vmem:[#allocation3] sm:$0xff] %vm20_vm0, %v101_v22 }
  0xf6   :  { %104 = vst.msk [vmem:[#allocation3 + $0x8] sm:$0xff] %vm20_vm0, %v102_v24 }
  0xf7   :  { %150 = shalt.err (!%p147_p4)
}
  0xf8   :  { %s151_s28 = scalar_lea.hbm %s233_s3, 256 }
  0xf9   :  { %p152_p5 = scmp.ne.s32.totalorder %s233_s3, %s151_s28  ;;  %p155_p6 = scmp.lt.u32.totalorder %s151_s28, %s233_s3 }
  0xfb   :  { %p157_p7 = pnand %p155_p6, %p152_p5 }
  0xfd   :  { %160 = shalt.err (!%p157_p7)
}
  0xfe   :  { %s166_s6 = smov 128   ;;  %s167_s7 = smov 8  }
  0xff   :  { %116 = dma.vmem_to_hbm [thread:$0]  %s111_s25, 256, %s233_s3, [#allocation4], %s166_s6, %s166_s6, %s167_s7  }
 0x100   :  { %161 = dma.done.wait [#allocation4], 256  }
 0x101   :  { %162 = vsyncadd [#allocation4], 4294967040 }
 0x102   :  { %120 = vsyncpa [#allocation4], 1 }

// kernel: _mha_forward.8
= control target key start
LH: loop header
LB: loop body
LE: loop exit
PB: predicated region body
PF: predicated region fallthrough
CT: control target
= control target key end

     0   :  { %v31_v0 = vlaneseq  ;;  %v2003_v1 = vmov 0.0   ;;  %v2004_v2 = vmov 1983009808   ;;  %v2005_v4 = vmov 1934713408   ;;  %s2474_s0 = inlined_call_operand.vmem [shape: f32[8,8,8], index: 0, kind: input, shape index: {}]   ;;  %s2475_s1 = inlined_call_operand.vmem [shape: f32[16,8,8], index: 1, kind: input, shape index: {}]   ;;  %s2476_s2 = inlined_call_operand.vmem [shape: f32[16,8,8], index: 2, kind: input, shape index: {}]   ;;  %s2477_s3 = inlined_call_operand.vmem [shape: f32[8,8,8], index: 3, kind: output, shape index: {0}]   ;;  %s2478_s4 = inlined_call_operand.hbm [shape: f32[8,8,16], index: 4, kind: output, shape index: {1}]  }
   0x1   :  { %1792 = vmatprep.subr.bf16.mxu0 %v2003_v1  ;;  %1798 = vmatprep.subr.bf16.mxu1 %v2003_v1  ;;  %v29_v3 = vunpack.c.l.s4 %v2004_v2  ;;  %v93_v5 = vunpack.c.l.s4 %v2005_v4  ;;  %vm2006_vm0 = vmmov 0   ;;  %v1895_v10 = vld [vmem:[%s2475_s1] ss:$16 sps:$4 sm:$0xff]   ;;  %v1897_v11 = vld [vmem:[%s2475_s1 + $0x4] ss:$16 sps:$4 sm:$0xff]   ;;  %vm754_vm1 = vcmask 64512  }
   0x2   :  { %v32_v6 = vshrl.u32 %v31_v0, 7  ;;  %1794 = vmatprep.mubr.msk.bf16.mxu0 %vm2006_vm0, %v2003_v1  ;;  %1800 = vmatprep.mubr.msk.bf16.mxu1 %vm2006_vm0, %v2003_v1  ;;  %v1898_v12 = vld [vmem:[%s2475_s1 + $0x8] ss:$16 sps:$4 sm:$0xff]   ;;  %v1900_v13 = vld [vmem:[%s2475_s1 + $0xc] ss:$16 sps:$4 sm:$0xff]  }
   0x3   :  { %v30_v7 = vunpack.c.0.s8 %v29_v3  ;;  %v94_v8 = vunpack.c.0.s8 %v93_v5  ;;  %v1901_v14 = vld [vmem:[%s2475_s1 + $0x20] ss:$16 sps:$4 sm:$0xff]   ;;  %v1903_v15 = vld [vmem:[%s2475_s1 + $0x24] ss:$16 sps:$4 sm:$0xff]   ;;  %v1904_v19 = vld [vmem:[%s2475_s1 + $0x28] ss:$16 sps:$4 sm:$0xff]  }
   0x4   :  { %v1906_v20 = vld [vmem:[%s2475_s1 + $0x2c] ss:$16 sps:$4 sm:$0xff]   ;;  %v1907_v21 = vld [vmem:[%s2475_s1 + $0x40] ss:$16 sps:$4 sm:$0xff]   ;;  %v1910_v24 = vld [vmem:[%s2475_s1 + $0x48] ss:$16 sps:$4 sm:$0xff]  }
   0x5   :  { %v2041_v9 = vsub.s32 %v30_v7, %v32_v6  ;;  %v2061_v16 = vsub.s32 %v94_v8, %v32_v6  ;;  %v1909_v28 = vld [vmem:[%s2475_s1 + $0x44] ss:$16 sps:$4 sm:$0xff]   ;;  %v1913_v30 = vld [vmem:[%s2475_s1 + $0x60] ss:$16 sps:$4 sm:$0xff]   ;;  %v1916_v31 = vld [vmem:[%s2475_s1 + $0x68] ss:$16 sps:$4 sm:$0xff]  }
   0x6   :  { %v1919_v47 = vld [vmem:[%s2474_s0] ss:$16 sps:$4 sm:$0xff]   ;;  %v1922_v48 = vld [vmem:[%s2474_s0 + $0x8] ss:$16 sps:$4 sm:$0xff]  }
   0x7   :  { %v186_v17 = vrot.slane %v1895_v10, %v2041_v9  ;;  %v202_v18 = vrot.slane %v1898_v12, %v2041_v9  ;;  %v2075_v22 = vrot.slane %v1897_v11, %v2041_v9  ;;  %v218_v23 = vrot.slane %v1901_v14, %v2041_v9  ;;  %v1925_v52 = vld [vmem:[%s2474_s0 + $0x20] ss:$16 sps:$4 sm:$0xff]   ;;  %v1928_v60 = vld [vmem:[%s2474_s0 + $0x28] ss:$16 sps:$4 sm:$0xff]  }
   0x8   :  { %v2082_v25 = vrot.slane %v1900_v13, %v2041_v9  ;;  %v234_v26 = vrot.slane %v1904_v19, %v2041_v9  ;;  %v322_v29 = vrot.slane %v1907_v21, %v2041_v9  ;;  %v338_v33 = vrot.slane %v1910_v24, %v2041_v9 }
   0x9   :  { %v242_v27 = vcombine.low %v186_v17, %v202_v18  ;;  %v243_v32 = vcombine.high %v186_v17, %v202_v18  ;;  %v2097_v34 = vrot.slane %v1903_v15, %v2041_v9  ;;  %v2100_v35 = vrot.slane %v1906_v20, %v2041_v9 }
   0xa   :  { %v258_v36 = vcombine.low %v2075_v22, %v2082_v25  ;;  %v274_v38 = vcombine.low %v218_v23, %v234_v26  ;;  %v354_v39 = vrot.slane %v1913_v30, %v2041_v9  ;;  %v370_v40 = vrot.slane %v1916_v31, %v2041_v9 }
   0xb   :  { %v250_v37 = vrot.slane %v242_v27, %v2061_v16  ;;  %v378_v41 = vcombine.low %v322_v29, %v338_v33  ;;  %v257_v42 = vrot.slane %v243_v32, %v2061_v16  ;;  %v275_v43 = vcombine.high %v218_v23, %v234_v26 }
   0xc   :  { %v379_v44 = vcombine.high %v322_v29, %v338_v33  ;;  %v282_v45 = vrot.slane %v274_v38, %v2061_v16  ;;  %v410_v46 = vcombine.low %v354_v39, %v370_v40  ;;  %v411_v49 = vcombine.high %v354_v39, %v370_v40 }
   0xd   :  { %v2116_v50 = vrot.slane %v1909_v28, %v2041_v9  ;;  %v386_v51 = vrot.slane %v378_v41, %v2061_v16  ;;  %v289_v53 = vrot.slane %v275_v43, %v2061_v16  ;;  %v290_v55 = vcombine.low %v2097_v34, %v2100_v35 }
   0xe   :  { %v393_v54 = vrot.slane %v379_v44, %v2061_v16  ;;  %v306_v56 = vcombine.low %v250_v37, %v282_v45  ;;  %v418_v57 = vrot.slane %v410_v46, %v2061_v16  ;;  %v307_v58 = vcombine.high %v250_v37, %v282_v45 }
   0xf   :  { %v34_v59 = vrot.slane %v1919_v47, %v2041_v9 }
  0x10   :  { %10 = vsyncpa [#allocation3], 0  ;;  %v50_v61 = vrot.slane %v1922_v48, %v2041_v9  ;;  %v66_v62 = vrot.slane %v1925_v52, %v2041_v9  ;;  %v308_v63 = vcombine.low %v257_v42, %v289_v53  ;;  %v425_v0 = vrot.slane %v411_v49, %v2061_v16  ;;  %v1912_v6 = vld [vmem:[%s2475_s1 + $0x4c] ss:$16 sps:$4 sm:$0xff]   ;;  %v1915_v17 = vld [vmem:[%s2475_s1 + $0x64] ss:$16 sps:$4 sm:$0xff]  }
  0x11   :  { %v442_v2 = vcombine.low %v386_v51, %v418_v57  ;;  %v443_v3 = vcombine.high %v386_v51, %v418_v57  ;;  %v82_v4 = vrot.slane %v1928_v60, %v2041_v9  ;;  %v309_v5 = vcombine.high %v257_v42, %v289_v53  ;;  %v1918_v18 = vld [vmem:[%s2475_s1 + $0x6c] ss:$16 sps:$4 sm:$0xff]   ;;  %v1921_v29 = vld [vmem:[%s2474_s0 + $0x4] ss:$16 sps:$4 sm:$0xff]  }
  0x12   :  { %v90_v7 = vcombine.low %v34_v59, %v50_v61  ;;  %v91_v8 = vcombine.high %v34_v59, %v50_v61  ;;  %v444_v10 = vcombine.low %v393_v54, %v425_v0  ;;  %v445_v11 = vcombine.high %v393_v54, %v425_v0  ;;  %v1924_v30 = vld [vmem:[%s2474_s0 + $0xc] ss:$16 sps:$4 sm:$0xff]   ;;  %v1927_v37 = vld [vmem:[%s2474_s0 + $0x24] ss:$16 sps:$4 sm:$0xff]  }
  0x13   :  { %v746_v12 = vpack.c.bf16 %v442_v2, %v306_v56  ;;  %v747_v13 = vpack.c.bf16 %v443_v3, %v307_v58  ;;  %v122_v14 = vcombine.low %v66_v62, %v82_v4  ;;  %v123_v15 = vcombine.high %v66_v62, %v82_v4  ;;  %v1930_v38 = vld [vmem:[%s2474_s0 + $0x2c] ss:$16 sps:$4 sm:$0xff]  }
  0x14   :  { %v98_v19 = vrot.slane %v90_v7, %v2061_v16  ;;  %v748_v20 = vpack.c.bf16 %v444_v10, %v308_v63  ;;  %v749_v21 = vpack.c.bf16 %v445_v11, %v309_v5  ;;  %v105_v23 = vrot.slane %v91_v8, %v2061_v16 }
  0x15   :  { %v759_v24 = vsel %vm754_vm1, %v746_v12, 0  ;;  %v805_v26 = vsel %vm754_vm1, %v747_v13, 0  ;;  %v130_v27 = vrot.slane %v122_v14, %v2061_v16  ;;  %v137_v28 = vrot.slane %v123_v15, %v2061_v16 }
  0x16   :  { %1793 = vmatpush3.bf16.xpose.msra.mxu0 %v759_v24  ;;  %1799 = vmatpush3.bf16.xpose.msra.mxu1 %v805_v26  ;;  %v266_v31 = vrot.slane %v258_v36, %v2061_v16  ;;  %v298_v32 = vrot.slane %v290_v55, %v2061_v16  ;;  %v345_v33 = vrot.slane %v1912_v6, %v2041_v9  ;;  %v851_v36 = vsel %vm754_vm1, %v748_v20, 0 }
  0x17   :  { %v154_v39 = vcombine.low %v98_v19, %v130_v27  ;;  %v155_v40 = vcombine.high %v98_v19, %v130_v27  ;;  %1804 = vmatprep.subr.bf16.mxu0 %v2003_v1  ;;  %1810 = vmatprep.subr.bf16.mxu1 %v2003_v1  ;;  %v897_v41 = vsel %vm754_vm1, %v749_v21, 0  ;;  %v156_v42 = vcombine.low %v105_v23, %v137_v28 }
  0x18   :  { %v361_v43 = vrot.slane %v1915_v17, %v2041_v9  ;;  %v377_v44 = vrot.slane %v1918_v18, %v2041_v9  ;;  %v157_v47 = vcombine.high %v105_v23, %v137_v28  ;;  %v394_v48 = vcombine.low %v2116_v50, %v345_v33 }
  0x19   :  { %v738_v45 = vpack.c.bf16 %v154_v39, %v154_v39  ;;  %v739_v46 = vpack.c.bf16 %v155_v40, %v155_v40  ;;  %v310_v49 = vcombine.low %v266_v31, %v298_v32  ;;  %v311_v52 = vcombine.high %v266_v31, %v298_v32 }
  0x1a   :  { %v426_v51 = vcombine.low %v361_v43, %v377_v44  ;;  %v41_v53 = vrot.slane %v1921_v29, %v2041_v9  ;;  %v402_v54 = vrot.slane %v394_v48, %v2061_v16  ;;  %v57_v55 = vrot.slane %v1924_v30, %v2041_v9 }
  0x1b   :  { %v73_v56 = vrot.slane %v1927_v37, %v2041_v9  ;;  %v89_v57 = vrot.slane %v1930_v38, %v2041_v9  ;;  %v259_v59 = vcombine.high %v2075_v22, %v2082_v25  ;;  %v291_v60 = vcombine.high %v2097_v34, %v2100_v35 }
  0x1c   :  { %v434_v58 = vrot.slane %v426_v51, %v2061_v16  ;;  %v395_v61 = vcombine.high %v2116_v50, %v345_v33  ;;  %v106_v62 = vcombine.low %v41_v53, %v57_v55  ;;  %v427_v0 = vcombine.high %v361_v43, %v377_v44 }
  0x1d   :  { %1795 = vmatmul.mubr.msk.bf16.vlgmr.msra.gmra.mrb[0].mxu0 %vm754_vm1, %v738_v45  ;;  %1801 = vmatmul.mubr.msk.bf16.vlgmr.msra.gmra.mrb[0].mxu1 %vm754_vm1, %v739_v46  ;;  %v138_v63 = vcombine.low %v73_v56, %v89_v57  ;;  %v273_v4 = vrot.slane %v259_v59, %v2061_v16  ;;  %v305_v34 = vrot.slane %v291_v60, %v2061_v16  ;;  %vm1123_vm2 = vcmask 130048  }
  0x1e   :  { %1805 = vmatpush3.bf16.xpose.msra.mxu0 %v851_v36  ;;  %1811 = vmatpush3.bf16.xpose.msra.mxu1 %v897_v41  ;;  %v446_v2 = vcombine.low %v402_v54, %v434_v58  ;;  %v447_v3 = vcombine.high %v402_v54, %v434_v58  ;;  %v114_v22 = vrot.slane %v106_v62, %v2061_v16 }
  0x1f   :  { %1806 = vmatprep.mubr.msk.bf16.mxu0 %vm2006_vm0, %v2003_v1  ;;  %1812 = vmatprep.mubr.msk.bf16.mxu1 %vm2006_vm0, %v2003_v1  ;;  %v146_v25 = vrot.slane %v138_v63, %v2061_v16  ;;  %v409_v5 = vrot.slane %v395_v61, %v2061_v16  ;;  %v740_v6 = vpack.c.bf16 %v156_v42, %v156_v42 }
  0x20   :  { %1816 = vmatprep.subr.bf16.mxu0 %v2003_v1  ;;  %1822 = vmatprep.subr.bf16.mxu1 %v2003_v1  ;;  %v750_v35 = vpack.c.bf16 %v446_v2, %v310_v49  ;;  %v751_v50 = vpack.c.bf16 %v447_v3, %v311_v52  ;;  %v741_v7 = vpack.c.bf16 %v157_v47, %v157_v47 }
  0x21   :  { %v441_v8 = vrot.slane %v427_v0, %v2061_v16  ;;  %v312_v11 = vcombine.low %v273_v4, %v305_v34  ;;  %v313_v14 = vcombine.high %v273_v4, %v305_v34  ;;  %v158_v17 = vcombine.low %v114_v22, %v146_v25 }
  0x22   :  { %v943_v10 = vsel %vm754_vm1, %v750_v35, 0  ;;  %v989_v12 = vsel %vm754_vm1, %v751_v50, 0  ;;  %v159_v18 = vcombine.high %v114_v22, %v146_v25  ;;  %v107_v19 = vcombine.high %v41_v53, %v57_v55 }
  0x23   :  { %v448_v13 = vcombine.low %v409_v5, %v441_v8  ;;  %v449_v15 = vcombine.high %v409_v5, %v441_v8  ;;  %v139_v20 = vcombine.high %v73_v56, %v89_v57  ;;  %v742_v24 = vpack.c.bf16 %v158_v17, %v158_v17 }
  0x24   :  { %v743_v26 = vpack.c.bf16 %v159_v18, %v159_v18  ;;  %v121_v27 = vrot.slane %v107_v19, %v2061_v16 }
  0x25   :  { %1807 = vmatmul.mubr.msk.bf16.vlgmr.msra.gmra.mrb[4].mxu0 %vm754_vm1, %v740_v6  ;;  %1813 = vmatmul.mubr.msk.bf16.vlgmr.msra.gmra.mrb[4].mxu1 %vm754_vm1, %v741_v7  ;;  %v752_v21 = vpack.c.bf16 %v448_v13, %v312_v11  ;;  %v753_v23 = vpack.c.bf16 %v449_v15, %v313_v14  ;;  %v153_v28 = vrot.slane %v139_v20, %v2061_v16 }
  0x26   :  { %1817 = vmatpush3.bf16.xpose.msra.mxu0 %v943_v10  ;;  %1823 = vmatpush3.bf16.xpose.msra.mxu1 %v989_v12 }
  0x27   :  { %1818 = vmatprep.mubr.msk.bf16.mxu0 %vm2006_vm0, %v2003_v1  ;;  %1824 = vmatprep.mubr.msk.bf16.mxu1 %vm2006_vm0, %v2003_v1  ;;  %v1035_v29 = vsel %vm754_vm1, %v752_v21, 0  ;;  %v1081_v30 = vsel %vm754_vm1, %v753_v23, 0  ;;  %v160_v31 = vcombine.low %v121_v27, %v153_v28  ;;  %v161_v32 = vcombine.high %v121_v27, %v153_v28 }
  0x28   :  { %1828 = vmatprep.subr.bf16.mxu0 %v2003_v1  ;;  %1834 = vmatprep.subr.bf16.mxu1 %v2003_v1 }
  0x29   :  { %v744_v33 = vpack.c.bf16 %v160_v31, %v160_v31  ;;  %v745_v37 = vpack.c.bf16 %v161_v32, %v161_v32 }
  0x2d   :  { %1819 = vmatmul.mubr.msk.bf16.vlgmr.msra.gmra.mrb[8].mxu0 %vm754_vm1, %v742_v24  ;;  %1825 = vmatmul.mubr.msk.bf16.vlgmr.msra.gmra.mrb[8].mxu1 %vm754_vm1, %v743_v26 }
  0x2e   :  { %1829 = vmatpush3.bf16.xpose.msra.mxu0 %v1035_v29  ;;  %1835 = vmatpush3.bf16.xpose.msra.mxu1 %v1081_v30 }
  0x2f   :  { %1830 = vmatprep.mubr.msk.bf16.mxu0 %vm2006_vm0, %v2003_v1  ;;  %1836 = vmatprep.mubr.msk.bf16.mxu1 %vm2006_vm0, %v2003_v1 }
  0x30   :  { %1840 = vmatprep.subr.bf16.mxu0 %v2003_v1  ;;  %1846 = vmatprep.subr.bf16.mxu1 %v2003_v1 }
  0x35   :  { %1831 = vmatmul.mubr.msk.bf16.vlgmr.msra.gmra.mrb[12].mxu0 %vm754_vm1, %v744_v33  ;;  %1837 = vmatmul.mubr.msk.bf16.vlgmr.msra.gmra.mrb[12].mxu1 %vm754_vm1, %v745_v37 }
  0x36   :  { %1842 = vmatprep.mubr.msk.bf16.mxu0 %vm2006_vm0, %v2003_v1  ;;  %1848 = vmatprep.mubr.msk.bf16.mxu1 %vm2006_vm0, %v2003_v1 }
  0xf0   :  { %v795_v38 = vpop.f32.mrb[0].mxu0  ;;  %v841_v39 = vpop.f32.mrb[0].mxu1 }
  0xf1   :  { %v1796_v40 = vpop.f32.mrb[1].mxu0  ;;  %v1124_v36 = vsel %vm1123_vm2, %v795_v38, -inf  ;;  %v1802_v41 = vpop.f32.mrb[1].mxu1  ;;  %v1127_v46 = vsel %vm1123_vm2, %v841_v39, -inf }
  0xf2   :  { %1125 = vmax.xlane.f32.xlu0 %v1124_v36  ;;  %v798_v42 = vpop.f32.mrb[2].mxu0  ;;  %v844_v43 = vpop.f32.mrb[2].mxu1 }
  0xf3   :  { %v1797_v44 = vpop.f32.mrb[3].mxu0  ;;  %v1803_v45 = vpop.f32.mrb[3].mxu1 }
  0xf6   :  { %1128 = vmax.xlane.f32.xlu0 %v1127_v46 }
  0xf8   :  { %v887_v47 = vpop.f32.mrb[4].mxu0  ;;  %v933_v48 = vpop.f32.mrb[4].mxu1 }
  0xf9   :  { %v1808_v49 = vpop.f32.mrb[5].mxu0  ;;  %v1130_v51 = vsel %vm1123_vm2, %v887_v47, -inf  ;;  %v1814_v52 = vpop.f32.mrb[5].mxu1  ;;  %v1133_v57 = vsel %vm1123_vm2, %v933_v48, -inf }
  0xfa   :  { %1131 = vmax.xlane.f32.xlu1 %v1130_v51  ;;  %v890_v53 = vpop.f32.mrb[6].mxu0  ;;  %v936_v54 = vpop.f32.mrb[6].mxu1  ;;  %v1931_v52 = vld [vmem:[%s2476_s2] ss:$16 sps:$4 sm:$0xff]  }
  0xfb   :  { %v1809_v55 = vpop.f32.mrb[7].mxu0  ;;  %v1815_v56 = vpop.f32.mrb[7].mxu1  ;;  %v1933_v53 = vld [vmem:[%s2476_s2 + $0x8] ss:$16 sps:$4 sm:$0xff]  }
  0xfc   :  { %v1935_v55 = vld [vmem:[%s2476_s2 + $0x20] ss:$16 sps:$4 sm:$0xff]   ;;  %v1937_v56 = vld [vmem:[%s2476_s2 + $0x28] ss:$16 sps:$4 sm:$0xff]  }
  0xfe   :  { %1134 = vmax.xlane.f32.xlu1 %v1133_v57  ;;  %v474_v57 = vrot.slane %v1931_v52, %v2041_v9  ;;  %v456_v52 = vld [vmem:[%s2476_s2 + $0x30] sm:$0xff] }
 0x100   :  { %v979_v58 = vpop.f32.mrb[8].mxu0  ;;  %v1025_v59 = vpop.f32.mrb[8].mxu1 }
 0x101   :  { %v1139_v60 = vsel %vm1123_vm2, %v1025_v59, -inf  ;;  %v1136_v61 = vsel %vm1123_vm2, %v979_v58, -inf  ;;  %v1820_v62 = vpop.f32.mrb[9].mxu0  ;;  %v1826_v63 = vpop.f32.mrb[9].mxu1 }
 0x102   :  { %1140 = vmax.xlane.f32.xlu1 %v1139_v60  ;;  %1137 = vmax.xlane.f32.xlu0 %v1136_v61  ;;  %v982_v0 = vpop.f32.mrb[10].mxu0  ;;  %v1028_v2 = vpop.f32.mrb[10].mxu1  ;;  %v1941_v60 = vld [vmem:[%s2476_s2 + $0x48] ss:$16 sps:$4 sm:$0xff]   ;;  %v1943_v61 = vld [vmem:[%s2476_s2 + $0x60] ss:$16 sps:$4 sm:$0xff]   ;;  %v506_v62 = vrot.slane %v1935_v55, %v2041_v9  ;;  %v522_v63 = vrot.slane %v1937_v56, %v2041_v9 }
 0x103   :  { %v1821_v3 = vpop.f32.mrb[11].mxu0  ;;  %v1827_v4 = vpop.f32.mrb[11].mxu1  ;;  %v1945_v0 = vld [vmem:[%s2476_s2 + $0x68] ss:$16 sps:$4 sm:$0xff]   ;;  %v460_v56 = vld [vmem:[%s2476_s2 + $0x50] sm:$0xff] }
 0x104   :  { %v626_v4 = vrot.slane %v1941_v60, %v2041_v9  ;;  %v459_v55 = vld [vmem:[%s2476_s2 + $0x48] sm:$0xff]  ;;  %v464_v60 = vld [vmem:[%s2476_s2 + $0x70] sm:$0xff] }
 0x108   :  { %v1071_v22 = vpop.f32.mrb[12].mxu0  ;;  %v1117_v25 = vpop.f32.mrb[12].mxu1 }
 0x109   :  { %v1145_v34 = vsel %vm1123_vm2, %v1117_v25, -inf  ;;  %v1142_v35 = vsel %vm1123_vm2, %v1071_v22, -inf  ;;  %v1832_v50 = vpop.f32.mrb[13].mxu0  ;;  %v1838_v5 = vpop.f32.mrb[13].mxu1 }
 0x10a   :  { %1146 = vmax.xlane.f32.xlu1 %v1145_v34  ;;  %1143 = vmax.xlane.f32.xlu0 %v1142_v35  ;;  %v1074_v6 = vpop.f32.mrb[14].mxu0  ;;  %v1120_v7 = vpop.f32.mrb[14].mxu1  ;;  %v658_v34 = vrot.slane %v1945_v0, %v2041_v9 }
 0x10b   :  { %v1833_v8 = vpop.f32.mrb[15].mxu0  ;;  %v1839_v10 = vpop.f32.mrb[15].mxu1 }
 0x17f   :  { %v1126_v11 = vpop.xlane.xlu0 %1125 }
 0x180   :  { %v1148_v12 = vsub.f32 %v795_v38, %v1126_v11 }
 0x182   :  { %v1156_v13 = vmul.f32 1.442695, %v1148_v12 }
 0x183   :  { %v1129_v14 = vpop.xlane.xlu0 %1128 }
 0x184   :  { %1947 = vpow2.f32 %v1156_v13  ;;  %v1149_v15 = vsub.f32 %v841_v39, %v1129_v14 }
 0x186   :  { %v1158_v17 = vmul.f32 1.442695, %v1149_v15 }
 0x187   :  { %v1132_v18 = vpop.xlane.xlu1 %1131 }
 0x188   :  { %1949 = vpow2.f32 %v1158_v17  ;;  %v1150_v19 = vsub.f32 %v887_v47, %v1132_v18 }
 0x18a   :  { %v1160_v20 = vmul.f32 1.442695, %v1150_v19 }
 0x18b   :  { %v1135_v21 = vpop.xlane.xlu1 %1134 }
 0x18c   :  { %1951 = vpow2.f32 %v1160_v20  ;;  %v1151_v23 = vsub.f32 %v933_v48, %v1135_v21  ;;  %v563_v20 = vcombine.high %v506_v62, %v522_v63 }
 0x18e   :  { %v2233_v24 = vpop.eup %1947  ;;  %v1162_v26 = vmul.f32 1.442695, %v1151_v23 }
 0x18f   :  { %v1141_v27 = vpop.xlane.xlu1 %1140  ;;  %v1138_v28 = vpop.xlane.xlu0 %1137  ;;  %v1172_v29 = vsel %vm1123_vm2, %v2233_v24, 0.0 }
 0x190   :  { %1953 = vpow2.f32 %v1162_v26  ;;  %v1153_v30 = vsub.f32 %v1025_v59, %v1141_v27  ;;  %v1152_v31 = vsub.f32 %v979_v58, %v1138_v28  ;;  %1173 = vadd.xlane.f32.xlu0 %v1172_v29  ;;  %v490_v58 = vrot.slane %v1933_v53, %v2041_v9  ;;  %v1939_v59 = vld [vmem:[%s2476_s2 + $0x40] ss:$16 sps:$4 sm:$0xff]   ;;  %v457_v53 = vld [vmem:[%s2476_s2 + $0x38] sm:$0xff] }
 0x191   :  { %v610_v3 = vrot.slane %v1939_v59, %v2041_v9  ;;  %v577_v29 = vrot.slane %v563_v20, %v2061_v16  ;;  %v463_v59 = vld [vmem:[%s2476_s2 + $0x68] sm:$0xff] }
 0x192   :  { %v2237_v32 = vpop.eup %1949  ;;  %v1166_v33 = vmul.f32 1.442695, %v1153_v30  ;;  %v1164_v37 = vmul.f32 1.442695, %v1152_v31  ;;  %v530_v2 = vcombine.low %v474_v57, %v490_v58  ;;  %v531_v19 = vcombine.high %v474_v57, %v490_v58  ;;  %v461_v57 = vld [vmem:[%s2476_s2 + $0x58] sm:$0xff]  ;;  %v462_v58 = vld [vmem:[%s2476_s2 + $0x60] sm:$0xff] }
 0x193   :  { %v1175_v38 = vsel %vm1123_vm2, %v2237_v32, 0.0  ;;  %v666_v50 = vcombine.low %v610_v3, %v626_v4  ;;  %v667_v23 = vcombine.high %v610_v3, %v626_v4 }
 0x194   :  { %1955 = vpow2.f32 %v1166_v33  ;;  %1176 = vadd.xlane.f32.xlu1 %v1175_v38  ;;  %v538_v35 = vrot.slane %v530_v2, %v2061_v16  ;;  %v545_v28 = vrot.slane %v531_v19, %v2061_v16 }
 0x195   :  { %1957 = vpow2.f32 %v1164_v37  ;;  %v674_v11 = vrot.slane %v666_v50, %v2061_v16  ;;  %v681_v30 = vrot.slane %v667_v23, %v2061_v16 }
 0x196   :  { %v2241_v39 = vpop.eup %1951  ;;  %v596_v33 = vcombine.low %v545_v28, %v577_v29 }
 0x197   :  { %v1147_v40 = vpop.xlane.xlu1 %1146  ;;  %v1144_v36 = vpop.xlane.xlu0 %1143  ;;  %v1178_v41 = vsel %vm1123_vm2, %v2241_v39, 0.0 }
 0x198   :  { %v1155_v42 = vsub.f32 %v1117_v25, %v1147_v40  ;;  %v1154_v43 = vsub.f32 %v1071_v22, %v1144_v36  ;;  %1179 = vadd.xlane.f32.xlu0 %v1178_v41  ;;  %v642_v22 = vrot.slane %v1943_v61, %v2041_v9  ;;  %v562_v25 = vcombine.low %v506_v62, %v522_v63  ;;  %v465_v61 = vld [vmem:[%s2476_s2 + $0x78] sm:$0xff] }
 0x199   :  { %v597_v40 = vcombine.high %v545_v28, %v577_v29 }
 0x19a   :  { %v2245_v44 = vpop.eup %1953  ;;  %v1170_v45 = vmul.f32 1.442695, %v1155_v42  ;;  %v1168_v46 = vmul.f32 1.442695, %v1154_v43  ;;  %v570_v6 = vrot.slane %v562_v25, %v2061_v16  ;;  %v698_v7 = vcombine.low %v642_v22, %v658_v34  ;;  %v450_v42 = vld [vmem:[%s2476_s2] sm:$0xff]  ;;  %v452_v43 = vld [vmem:[%s2476_s2 + $0x10] sm:$0xff] }
 0x19b   :  { %v1181_v47 = vsel %vm1123_vm2, %v2245_v44, 0.0  ;;  %v699_v26 = vcombine.high %v642_v22, %v658_v34  ;;  %v467_v62 = vcombine.high %v450_v42, %v452_v43  ;;  %v619_v22 = vcombine.high %v459_v55, %v461_v57 }
 0x19c   :  { %1959 = vpow2.f32 %v1170_v45  ;;  %1182 = vadd.xlane.f32.xlu1 %v1181_v47  ;;  %v594_v13 = vcombine.low %v538_v35, %v570_v6  ;;  %v706_v14 = vrot.slane %v698_v7, %v2061_v16  ;;  %v595_v17 = vcombine.high %v538_v35, %v570_v6  ;;  %v451_v45 = vld [vmem:[%s2476_s2 + $0x8] sm:$0xff]  ;;  %v454_v47 = vld [vmem:[%s2476_s2 + $0x20] sm:$0xff] }
 0x19d   :  { %1961 = vpow2.f32 %v1168_v46  ;;  %v713_v31 = vrot.slane %v699_v26, %v2061_v16  ;;  %v453_v46 = vld [vmem:[%s2476_s2 + $0x18] sm:$0xff]  ;;  %v499_v2 = vcombine.high %v454_v47, %v456_v52  ;;  %v635_v25 = vcombine.high %v462_v58, %v464_v60 }
 0x19e   :  { %v2249_v48 = vpop.eup %1955  ;;  %v730_v15 = vcombine.low %v674_v11, %v706_v14  ;;  %v731_v18 = vcombine.high %v674_v11, %v706_v14  ;;  %v483_v0 = vcombine.high %v451_v45, %v453_v46  ;;  %v651_v34 = vcombine.high %v463_v59, %v465_v61 }
 0x19f   :  { %v2251_v49 = vpop.eup %1957  ;;  %v1187_v51 = vsel %vm1123_vm2, %v2249_v48, 0.0  ;;  %v732_v37 = vcombine.low %v681_v30, %v713_v31  ;;  %v733_v36 = vcombine.high %v681_v30, %v713_v31  ;;  %v481_v35 = vrot.slane %v467_v62, %v2041_v9 }
 0x1a0   :  { %1188 = vadd.xlane.f32.xlu1 %v1187_v51  ;;  %v1184_v54 = vsel %vm1123_vm2, %v2251_v49, 0.0  ;;  %v1220_v21 = vpack.c.bf16 %v730_v15, %v594_v13  ;;  %v1221_v27 = vpack.c.bf16 %v731_v18, %v595_v17  ;;  %v455_v51 = vld [vmem:[%s2476_s2 + $0x28] sm:$0xff]  ;;  %v497_v6 = vrot.slane %v483_v0, %v2041_v9 }
 0x1a1   :  { %1185 = vadd.xlane.f32.xlu0 %v1184_v54  ;;  %v1222_v38 = vpack.c.bf16 %v732_v37, %v596_v33  ;;  %v2307_v41 = vpack.c.bf16 %v733_v36, %v597_v40  ;;  %v458_v54 = vld [vmem:[%s2476_s2 + $0x40] sm:$0xff]  ;;  %v515_v3 = vcombine.high %v455_v51, %v457_v53  ;;  %v513_v7 = vrot.slane %v499_v2, %v2041_v9  ;;  %s2007_s2 = smov [#allocation2]  }
 0x1a2   :  { %1841 = vmatpush3.bf16.msra.mxu0 %v1220_v21  ;;  %1847 = vmatpush3.bf16.msra.mxu1 %v1221_v27  ;;  %v603_v4 = vcombine.high %v458_v54, %v460_v56  ;;  %v649_v13 = vrot.slane %v635_v25, %v2041_v9  ;;  %v665_v14 = vrot.slane %v651_v34, %v2041_v9  ;;  %s1731_s29 = sshll.u32 %s2007_s2, 4  ;;  %s1732_s29 = int_to_ptr.vmem [resolvable:$true] %s1731_s29 }
 0x1a3   :  { %1852 = vmatprep.subr.bf16.mxu0 %v2003_v1  ;;  %1858 = vmatprep.subr.bf16.mxu1 %v2003_v1  ;;  %v546_v17 = vcombine.low %v481_v35, %v497_v6  ;;  %v547_v43 = vcombine.high %v481_v35, %v497_v6  ;;  %s1979_s30 = scalar_lea.vmem %s1732_s29, 1024  ;;  %p1984_p1 = scmp.lt.s32.totalorder %s1732_s29, %s1732_s29 }
 0x1a4   :  { %v617_v11 = vrot.slane %v603_v4, %v2041_v9  ;;  %v714_v20 = vcombine.low %v649_v13, %v665_v14  ;;  %v715_v47 = vcombine.high %v649_v13, %v665_v14  ;;  %p1980_p0 = scmp.ne.s32.totalorder %s1732_s29, %s1979_s30  ;;  %p1985_p2 = scmp.lt.s32.totalorder %s1979_s30, %s1979_s30 }
 0x1a5   :  { %v554_v27 = vrot.slane %v546_v17, %v2061_v16  ;;  %v561_v55 = vrot.slane %v547_v43, %v2061_v16 }
 0x1a6   :  { %v2290_v5 = vpop.eup %1959  ;;  %v722_v30 = vrot.slane %v714_v20, %v2061_v16  ;;  %v729_v58 = vrot.slane %v715_v47, %v2061_v16  ;;  %p1986_p3 = por %p1985_p2, %p1984_p1 }
 0x1a7   :  { %v2293_v8 = vpop.eup %1961  ;;  %v1193_v10 = vsel %vm1123_vm2, %v2290_v5, 0.0 }
 0x1a8   :  { %1194 = vadd.xlane.f32.xlu1 %v1193_v10  ;;  %v1190_v12 = vsel %vm1123_vm2, %v2293_v8, 0.0  ;;  %v529_v10 = vrot.slane %v515_v3, %v2041_v9  ;;  %p1987_p4 = pnand %p1986_p3, %p1980_p0 }
 0x1a9   :  { %1191 = vadd.xlane.f32.xlu0 %v1190_v12  ;;  %v633_v12 = vrot.slane %v619_v22, %v2041_v9 }
 0x1aa   :  { %v578_v18 = vcombine.low %v513_v7, %v529_v10  ;;  %v579_v45 = vcombine.high %v513_v7, %v529_v10 }
 0x1ab   :  { %v682_v19 = vcombine.low %v617_v11, %v633_v12 }
 0x1ac   :  { %v586_v28 = vrot.slane %v578_v18, %v2061_v16  ;;  %v593_v57 = vrot.slane %v579_v45, %v2061_v16 }
 0x1ad   :  { %v690_v29 = vrot.slane %v682_v19, %v2061_v16 }
 0x1ae   :  { %v600_v0 = vcombine.low %v561_v55, %v593_v57  ;;  %v601_v25 = vcombine.high %v561_v55, %v593_v57 }
 0x1af   :  { %v734_v42 = vcombine.low %v690_v29, %v722_v30  ;;  %v735_v54 = vcombine.high %v690_v29, %v722_v30 }
 0x21d   :  { %v1174_v63 = vpop.xlane.xlu0 %1173 }
 0x21e   :  { %1963 = vrcp.f32 %v1174_v63 }
 0x221   :  { %v1177_v50 = vpop.xlane.xlu1 %1176 }
 0x222   :  { %1965 = vrcp.f32 %v1177_v50 }
 0x225   :  { %v1180_v15 = vpop.xlane.xlu0 %1179 }
 0x226   :  { %1967 = vrcp.f32 %v1180_v15 }
 0x228   :  { %v1964_v21 = vpop.eup %1963 }
 0x229   :  { %v1197_v23 = vmul.f32 %v1964_v21, %v2233_v24  ;;  %v1183_v26 = vpop.xlane.xlu1 %1182  ;;  %v598_v24 = vcombine.low %v554_v27, %v586_v28 }
 0x22a   :  { %1969 = vrcp.f32 %v1183_v26 }
 0x22b   :  { %1716 = vst.msk [vmem:[#allocation2] sm:$0xff] %vm1123_vm2, %v1197_v23  ;;  %v1212_v31 = vpack.c.bf16 %v1197_v23, %v1197_v23  ;;  %v1224_v53 = vpack.c.bf16 %v734_v42, %v598_v24 }
 0x22c   :  { %v1966_v33 = vpop.eup %1965 }
 0x22d   :  { %v1199_v37 = vmul.f32 %v1966_v33, %v2237_v32  ;;  %v1189_v40 = vpop.xlane.xlu1 %1188  ;;  %1843 = vmatmul.mubr.msk.bf16.vlgmr.msra.gmra.mrb[16].mxu0 %vm1123_vm2, %v1212_v31  ;;  %v683_v32 = vcombine.high %v617_v11, %v633_v12 }
 0x22e   :  { %1971 = vrcp.f32 %v1189_v40  ;;  %v1186_v36 = vpop.xlane.xlu0 %1185  ;;  %1853 = vmatpush3.bf16.msra.mxu0 %v1222_v38  ;;  %1854 = vmatprep.mubr.msk.bf16.mxu0 %vm2006_vm0, %v2003_v1  ;;  %v599_v38 = vcombine.high %v554_v27, %v586_v28 }
 0x22f   :  { %1717 = vst.msk [vmem:[#allocation2 + $0x8] sm:$0xff] %vm1123_vm2, %v1199_v37  ;;  %1973 = vrcp.f32 %v1186_v36  ;;  %v1213_v46 = vpack.c.bf16 %v1199_v37, %v1199_v37  ;;  %1864 = vmatprep.subr.bf16.mxu0 %v2003_v1 }
 0x230   :  { %v1968_v51 = vpop.eup %1967  ;;  %v1225_v62 = vpack.c.bf16 %v735_v54, %v599_v38 }
 0x231   :  { %v1201_v52 = vmul.f32 %v1968_v51, %v2241_v39  ;;  %1849 = vmatmul.mubr.msk.bf16.vlgmr.msra.gmra.mrb[16].mxu1 %vm1123_vm2, %v1213_v46  ;;  %v697_v39 = vrot.slane %v683_v32, %v2061_v16 }
 0x232   :  { %1859 = vmatpush3.bf16.msra.mxu1 %v2307_v41  ;;  %1860 = vmatprep.mubr.msk.bf16.mxu1 %vm2006_vm0, %v2003_v1 }
 0x233   :  { %1718 = vst.msk [vmem:[#allocation2 + $0x10] sm:$0xff] %vm1123_vm2, %v1201_v52  ;;  %v1214_v56 = vpack.c.bf16 %v1201_v52, %v1201_v52  ;;  %1870 = vmatprep.subr.bf16.mxu1 %v2003_v1  ;;  %v736_v2 = vcombine.low %v697_v39, %v729_v58  ;;  %v737_v34 = vcombine.high %v697_v39, %v729_v58 }
 0x234   :  { %v1970_v59 = vpop.eup %1969 }
 0x235   :  { %v1203_v41 = vmul.f32 %v1970_v59, %v2245_v44  ;;  %v1195_v60 = vpop.xlane.xlu1 %1194  ;;  %1855 = vmatmul.mubr.msk.bf16.vlgmr.msra.gmra.mrb[20].mxu0 %vm1123_vm2, %v1214_v56  ;;  %v1226_v35 = vpack.c.bf16 %v736_v2, %v600_v0 }
 0x236   :  { %1975 = vrcp.f32 %v1195_v60  ;;  %v1192_v61 = vpop.xlane.xlu0 %1191  ;;  %1865 = vmatpush3.bf16.msra.mxu0 %v1224_v53  ;;  %1866 = vmatprep.mubr.msk.bf16.mxu0 %vm2006_vm0, %v2003_v1 }
 0x237   :  { %1719 = vst.msk [vmem:[#allocation2 + $0x18] sm:$0xff] %vm1123_vm2, %v1203_v41  ;;  %1977 = vrcp.f32 %v1192_v61  ;;  %v1215_v63 = vpack.c.bf16 %v1203_v41, %v1203_v41  ;;  %1876 = vmatprep.subr.bf16.mxu0 %v2003_v1 }
 0x238   :  { %v1972_v3 = vpop.eup %1971 }
 0x239   :  { %v1974_v44 = vpop.eup %1973  ;;  %v1207_v4 = vmul.f32 %v1972_v3, %v2249_v48  ;;  %1861 = vmatmul.mubr.msk.bf16.vlgmr.msra.gmra.mrb[20].mxu1 %vm1123_vm2, %v1215_v63  ;;  %v1227_v48 = vpack.c.bf16 %v737_v34, %v601_v25 }
 0x23a   :  { %v1205_v22 = vmul.f32 %v1974_v44, %v2251_v49  ;;  %1871 = vmatpush3.bf16.msra.mxu1 %v1225_v62  ;;  %1872 = vmatprep.mubr.msk.bf16.mxu1 %vm2006_vm0, %v2003_v1 }
 0x23b   :  { %1721 = vst.msk [vmem:[#allocation2 + $0x28] sm:$0xff] %vm1123_vm2, %v1207_v4  ;;  %1882 = vmatprep.subr.bf16.mxu1 %v2003_v1  ;;  %v1217_v6 = vpack.c.bf16 %v1207_v4, %v1207_v4 }
 0x23c   :  { %1720 = vst.msk [vmem:[#allocation2 + $0x20] sm:$0xff] %vm1123_vm2, %v1205_v22  ;;  %v1216_v50 = vpack.c.bf16 %v1205_v22, %v1205_v22 }
 0x23e   :  { %1867 = vmatmul.mubr.msk.bf16.vlgmr.msra.gmra.mrb[24].mxu0 %vm1123_vm2, %v1216_v50 }
 0x23f   :  { %1877 = vmatpush3.bf16.msra.mxu0 %v1226_v35  ;;  %1878 = vmatprep.mubr.msk.bf16.mxu0 %vm2006_vm0, %v2003_v1 }
 0x240   :  { %v1976_v49 = vpop.eup %1975 }
 0x241   :  { %v1978_v7 = vpop.eup %1977  ;;  %v1211_v10 = vmul.f32 %v1976_v49, %v2290_v5  ;;  %1873 = vmatmul.mubr.msk.bf16.vlgmr.msra.gmra.mrb[24].mxu1 %vm1123_vm2, %v1217_v6 }
 0x242   :  { %v1209_v11 = vmul.f32 %v1978_v7, %v2293_v8  ;;  %1883 = vmatpush3.bf16.msra.mxu1 %v1227_v48  ;;  %1884 = vmatprep.mubr.msk.bf16.mxu1 %vm2006_vm0, %v2003_v1 }
 0x243   :  { %1723 = vst.msk [vmem:[#allocation2 + $0x38] sm:$0xff] %vm1123_vm2, %v1211_v10  ;;  %v1219_v13 = vpack.c.bf16 %v1211_v10, %v1211_v10 }
 0x244   :  { %1722 = vst.msk [vmem:[#allocation2 + $0x30] sm:$0xff] %vm1123_vm2, %v1209_v11  ;;  %v1218_v12 = vpack.c.bf16 %v1209_v11, %v1209_v11 }
 0x246   :  { %1879 = vmatmul.mubr.msk.bf16.vlgmr.msra.gmra.mrb[28].mxu0 %vm1123_vm2, %v1218_v12 }
 0x249   :  { %1885 = vmatmul.mubr.msk.bf16.vlgmr.msra.gmra.mrb[28].mxu1 %vm1123_vm2, %v1219_v13 }
 0x24a   :  { %1990 = shalt.err (!%p1987_p4)
}
 0x24b   :  { %s1991_s6 = scalar_lea.hbm %s2478_s4, 1024 }
 0x24c   :  { %p1992_p5 = scmp.ne.s32.totalorder %s2478_s4, %s1991_s6  ;;  %p1995_p6 = scmp.lt.u32.totalorder %s1991_s6, %s2478_s4 }
 0x24e   :  { %p1997_p7 = pnand %p1995_p6, %p1992_p5 }
 0x250   :  { %2000 = shalt.err (!%p1997_p7)
}
 0x251   :  { %s2008_s10 = smov 128   ;;  %s2009_s11 = smov 8  }
 0x252   :  { %1737 = dma.vmem_to_hbm [thread:$0]  %s1732_s29, 1024, %s2478_s4, [#allocation3], %s2008_s10, %s2008_s10, %s2009_s11  }
 0x300   :  { %v1265_v1 = vpop.f32.mrb[16].mxu0 }
 0x301   :  { %v1844_v5 = vpop.f32.mrb[17].mxu0 }
 0x302   :  { %v1268_v8 = vpop.f32.mrb[18].mxu0 }
 0x303   :  { %v1845_v14 = vpop.f32.mrb[19].mxu0 }
 0x304   :  { %v1308_v15 = vpop.f32.mrb[16].mxu1 }
 0x305   :  { %v1850_v17 = vpop.f32.mrb[17].mxu1 }
 0x306   :  { %v1311_v18 = vpop.f32.mrb[18].mxu1 }
 0x307   :  { %v1851_v19 = vpop.f32.mrb[19].mxu1 }
 0x308   :  { %v1351_v20 = vpop.f32.mrb[20].mxu0 }
 0x309   :  { %v1572_v21 = vcombine.low %v1265_v1, %v1351_v20  ;;  %v1573_v23 = vcombine.high %v1265_v1, %v1351_v20  ;;  %v1856_v26 = vpop.f32.mrb[21].mxu0 }
 0x30a   :  { %v1354_v27 = vpop.f32.mrb[22].mxu0 }
 0x30b   :  { %v1857_v28 = vpop.f32.mrb[23].mxu0  ;;  %v1580_v40 = vrot.slane %v1572_v21, %v2041_v9  ;;  %v1587_v24 = vrot.slane %v1573_v23, %v2041_v9 }
 0x30c   :  { %v1394_v29 = vpop.f32.mrb[20].mxu1 }
 0x30d   :  { %v1588_v30 = vcombine.low %v1308_v15, %v1394_v29  ;;  %v1589_v31 = vcombine.high %v1308_v15, %v1394_v29  ;;  %v1862_v33 = vpop.f32.mrb[21].mxu1 }
 0x30e   :  { %v1397_v37 = vpop.f32.mrb[22].mxu1 }
 0x30f   :  { %v1596_v36 = vrot.slane %v1588_v30, %v2041_v9  ;;  %v1603_v42 = vrot.slane %v1589_v31, %v2041_v9  ;;  %v1863_v43 = vpop.f32.mrb[23].mxu1 }
 0x311   :  { %v1636_v45 = vcombine.low %v1580_v40, %v1596_v36  ;;  %v1637_v46 = vcombine.high %v1580_v40, %v1596_v36  ;;  %v1652_v32 = vcombine.low %v1587_v24, %v1603_v42  ;;  %v1653_v47 = vcombine.high %v1587_v24, %v1603_v42  ;;  %v1437_v51 = vpop.f32.mrb[24].mxu0 }
 0x312   :  { %v1868_v52 = vpop.f32.mrb[25].mxu0 }
 0x313   :  { %v1440_v38 = vpop.f32.mrb[26].mxu0  ;;  %v1644_v49 = vrot.slane %v1636_v45, %v2061_v16  ;;  %v1651_v7 = vrot.slane %v1637_v46, %v2061_v16  ;;  %v1660_v1 = vrot.slane %v1652_v32, %v2061_v16 }
 0x314   :  { %v1869_v53 = vpop.f32.mrb[27].mxu0  ;;  %v1480_v54 = vpop.f32.mrb[24].mxu1 }
 0x315   :  { %v1874_v55 = vpop.f32.mrb[25].mxu1 }
 0x316   :  { %v1483_v56 = vpop.f32.mrb[26].mxu1 }
 0x317   :  { %v1875_v57 = vpop.f32.mrb[27].mxu1 }
 0x319   :  { %v1523_v39 = vpop.f32.mrb[28].mxu0 }
 0x31a   :  { %v1604_v58 = vcombine.low %v1437_v51, %v1523_v39  ;;  %v1605_v59 = vcombine.high %v1437_v51, %v1523_v39  ;;  %v1880_v41 = vpop.f32.mrb[29].mxu0 }
 0x31b   :  { %v1526_v60 = vpop.f32.mrb[30].mxu0 }
 0x31c   :  { %v1881_v61 = vpop.f32.mrb[31].mxu0  ;;  %v1566_v62 = vpop.f32.mrb[28].mxu1  ;;  %v1612_v44 = vrot.slane %v1604_v58, %v2041_v9  ;;  %v1619_v4 = vrot.slane %v1605_v59, %v2041_v9 }
 0x31d   :  { %v1620_v63 = vcombine.low %v1480_v54, %v1566_v62  ;;  %v1621_v0 = vcombine.high %v1480_v54, %v1566_v62  ;;  %v1886_v2 = vpop.f32.mrb[29].mxu1 }
 0x31e   :  { %v1569_v3 = vpop.f32.mrb[30].mxu1 }
 0x31f   :  { %v1628_v22 = vrot.slane %v1620_v63, %v2041_v9  ;;  %v1635_v25 = vrot.slane %v1621_v0, %v2041_v9  ;;  %v1887_v34 = vpop.f32.mrb[31].mxu1  ;;  %v1667_v9 = vrot.slane %v1653_v47, %v2061_v16 }
 0x321   :  { %v1668_v35 = vcombine.low %v1612_v44, %v1628_v22  ;;  %v1669_v50 = vcombine.high %v1612_v44, %v1628_v22  ;;  %v1684_v48 = vcombine.low %v1619_v4, %v1635_v25  ;;  %v1685_v6 = vcombine.high %v1619_v4, %v1635_v25 }
 0x323   :  { %v1676_v10 = vrot.slane %v1668_v35, %v2061_v16  ;;  %v1683_v11 = vrot.slane %v1669_v50, %v2061_v16  ;;  %v1692_v12 = vrot.slane %v1684_v48, %v2061_v16  ;;  %v1699_v13 = vrot.slane %v1685_v6, %v2061_v16 }
 0x325   :  { %v1700_v5 = vcombine.low %v1644_v49, %v1676_v10  ;;  %v1701_v8 = vcombine.high %v1644_v49, %v1676_v10  ;;  %v1702_v14 = vcombine.low %v1651_v7, %v1683_v11  ;;  %v1703_v15 = vcombine.high %v1651_v7, %v1683_v11 }
 0x326   :  { %v1704_v17 = vcombine.low %v1660_v1, %v1692_v12  ;;  %v1705_v18 = vcombine.high %v1660_v1, %v1692_v12  ;;  %v1706_v19 = vcombine.low %v1667_v9, %v1699_v13  ;;  %v1707_v20 = vcombine.high %v1667_v9, %v1699_v13 }
 0x327   :  { %1708 = vst.msk [vmem:[%s2477_s3] sm:$0xff] %vm754_vm1, %v1700_v5  ;;  %1709 = vst.msk [vmem:[%s2477_s3 + $0x8] sm:$0xff] %vm754_vm1, %v1701_v8 }
 0x328   :  { %1710 = vst.msk [vmem:[%s2477_s3 + $0x10] sm:$0xff] %vm754_vm1, %v1702_v14  ;;  %1711 = vst.msk [vmem:[%s2477_s3 + $0x18] sm:$0xff] %vm754_vm1, %v1703_v15 }
 0x329   :  { %1712 = vst.msk [vmem:[%s2477_s3 + $0x20] sm:$0xff] %vm754_vm1, %v1704_v17  ;;  %1713 = vst.msk [vmem:[%s2477_s3 + $0x28] sm:$0xff] %vm754_vm1, %v1705_v18 }
 0x32a   :  { %1714 = vst.msk [vmem:[%s2477_s3 + $0x30] sm:$0xff] %vm754_vm1, %v1706_v19  ;;  %1715 = vst.msk [vmem:[%s2477_s3 + $0x38] sm:$0xff] %vm754_vm1, %v1707_v20 }
 0x32b   :  { %2001 = dma.done.wait [#allocation3], 1024  }
 0x32c   :  { %2002 = vsyncadd [#allocation3], 4294966272 }
 0x32d   :  { %1743 = vsyncpa [#allocation3], 1 }

// kernel: _mha_forward.5
= control target key start
LH: loop header
LB: loop body
LE: loop exit
PB: predicated region body
PF: predicated region fallthrough
CT: control target
= control target key end

     0   :  { %vm19_vm0 = vcmask 261120   ;;  %v123_v0 = vmov 0.0   ;;  %vm124_vm1 = vmmov 0   ;;  %s181_s1 = inlined_call_operand.vmem [shape: f32[32,32], index: 1, kind: input, shape index: {}]   ;;  %s182_s0 = inlined_call_operand.vmem [shape: f32[16,32], index: 0, kind: input, shape index: {}]   ;;  %s183_s2 = inlined_call_operand.vmem [shape: f32[1,32], index: 2, kind: input, shape index: {}]   ;;  %s184_s3 = inlined_call_operand.vmem [shape: f32[16,32], index: 3, kind: output, shape index: {}]  }
   0x1   :  { %113 = vmatprep.subr.bf16.mxu0 %v123_v0  ;;  %v27_v1 = vld [vmem:[%s181_s1] sm:$0xff]  ;;  %v28_v2 = vld [vmem:[%s181_s1 + $0x8] sm:$0xff]  ;;  %20 = vst.msk [vmem:[#allocation2] sm:$0xff] %vm19_vm0, %v123_v0  ;;  %21 = vst.msk [vmem:[#allocation2 + $0x8] sm:$0xff] %vm19_vm0, %v123_v0  ;;  %117 = vmatprep.mubr.msk.bf16.mxu0 %vm124_vm1, %v123_v0 }
   0x2   :  { %v31_v3 = vpack.c.bf16 %v28_v2, %v27_v1  ;;  %v29_v4 = vld [vmem:[%s181_s1 + $0x10] sm:$0xff]  ;;  %v30_v5 = vld [vmem:[%s181_s1 + $0x18] sm:$0xff]  ;;  %v24_v9 = vld [vmem:[%s182_s0] sm:$0xff] }
   0x3   :  { %v32_v7 = vpack.c.bf16 %v30_v5, %v29_v4  ;;  %v25_v10 = vld [vmem:[%s182_s0 + $0x8] sm:$0xff]  ;;  %v109_v20 = vld [vmem:[%s183_s2] ss:$0 sm:$0xff] }
   0x4   :  { %v38_v6 = vsel %vm19_vm0, %v31_v3, 0  ;;  %v26_v11 = vpack.c.bf16 %v25_v10, %v24_v9 }
   0x5   :  { %114 = vmatpush3.bf16.xpose.msra.mxu0 %v38_v6  ;;  %v41_v8 = vsel %vm19_vm0, %v32_v7, 0 }
   0x6   :  { %115 = vmatprep.subr.bf16.mxu0 %v123_v0 }
   0x8   :  { %v22_v12 = vld [vmem:[#allocation2] sm:$0xff]  ;;  %v23_v14 = vld [vmem:[#allocation2 + $0x8] sm:$0xff] }
   0xd   :  { %116 = vmatpush3.bf16.xpose.msra.mxu0 %v41_v8 }
  0x14   :  { %118 = vmatmul.mubr.msk.bf16.vlgmr.msra.gmra.mrb[0].mxu0 %vm19_vm0, %v26_v11 }
  0xe7   :  { %v77_v13 = vpop.f32.mrb[0].mxu0 }
  0xe8   :  { %v84_v15 = vadd.f32 %v77_v13, %v22_v12  ;;  %v119_v16 = vpop.f32.mrb[1].mxu0 }
  0xe9   :  { %v80_v17 = vpop.f32.mrb[2].mxu0 }
  0xea   :  { %86 = vst.msk [vmem:[#allocation2] sm:$0xff] %vm19_vm0, %v84_v15  ;;  %v85_v18 = vadd.f32 %v80_v17, %v23_v14  ;;  %v120_v19 = vpop.f32.mrb[3].mxu0 }
  0xec   :  { %87 = vst.msk [vmem:[#allocation2 + $0x8] sm:$0xff] %vm19_vm0, %v85_v18 }
  0xf1   :  { %v91_v21 = vld [vmem:[#allocation2] sm:$0xff] }
  0xf2   :  { %v100_v22 = vadd.f32 %v109_v20, %v91_v21 }
  0xf3   :  { %v92_v23 = vld [vmem:[#allocation2 + $0x8] sm:$0xff] }
  0xf4   :  { %102 = vst.msk [vmem:[%s184_s3] sm:$0xff] %vm19_vm0, %v100_v22  ;;  %v101_v24 = vadd.f32 %v109_v20, %v92_v23 }
  0xf6   :  { %103 = vst.msk [vmem:[%s184_s3 + $0x8] sm:$0xff] %vm19_vm0, %v101_v24 }

// kernel: _mha_forward.6
= control target key start
LH: loop header
LB: loop body
LE: loop exit
PB: predicated region body
PF: predicated region fallthrough
CT: control target
= control target key end

     0   :  { %vm19_vm0 = vcmask 261120   ;;  %v154_v3 = vmov 0.0   ;;  %s232_s1 = inlined_call_operand.vmem [shape: f32[32,32], index: 1, kind: input, shape index: {}]   ;;  %s233_s0 = inlined_call_operand.vmem [shape: f32[32,32], index: 0, kind: input, shape index: {}]   ;;  %s234_s2 = inlined_call_operand.vmem [shape: f32[1,32], index: 2, kind: input, shape index: {}]   ;;  %s235_s3 = inlined_call_operand.vmem [shape: f32[32,32], index: 3, kind: output, shape index: {}]  }
   0x1   :  { %v34_v0 = vld [vmem:[%s232_s1] sm:$0xff]  ;;  %v35_v1 = vld [vmem:[%s232_s1 + $0x8] sm:$0xff]  ;;  %v36_v2 = vld [vmem:[%s232_s1 + $0x10] sm:$0xff]  ;;  %22 = vst.msk [vmem:[#allocation2 + $0x10] sm:$0xff] %vm19_vm0, %v154_v3 }
   0x2   :  { %20 = vst.msk [vmem:[#allocation2] sm:$0xff] %vm19_vm0, %v154_v3  ;;  %21 = vst.msk [vmem:[#allocation2 + $0x8] sm:$0xff] %vm19_vm0, %v154_v3  ;;  %v38_v4 = vpack.c.bf16 %v35_v1, %v34_v0  ;;  %v37_v5 = vld [vmem:[%s232_s1 + $0x18] sm:$0xff]  ;;  %v28_v6 = vld [vmem:[%s233_s0] sm:$0xff] }
   0x3   :  { %23 = vst.msk [vmem:[#allocation2 + $0x18] sm:$0xff] %vm19_vm0, %v154_v3  ;;  %v29_v7 = vld [vmem:[%s233_s0 + $0x8] sm:$0xff]  ;;  %v39_v8 = vpack.c.bf16 %v37_v5, %v36_v2  ;;  %v30_v12 = vld [vmem:[%s233_s0 + $0x10] sm:$0xff]  ;;  %v31_v13 = vld [vmem:[%s233_s0 + $0x18] sm:$0xff] }
   0x4   :  { %v32_v9 = vpack.c.bf16 %v29_v7, %v28_v6  ;;  %151 = vmatprep.subr.msk.bf16.mxu0 %vm19_vm0, %v38_v4  ;;  %v48_v10 = vsel %vm19_vm0, %v38_v4, 0  ;;  %v33_v14 = vpack.c.bf16 %v31_v13, %v30_v12  ;;  %v138_v27 = vld [vmem:[%s234_s2] ss:$0 sm:$0xff] }
   0x5   :  { %144 = vmatpush3.bf16.xpose.msra.mxu0 %v48_v10  ;;  %v51_v11 = vsel %vm19_vm0, %v39_v8, 0 }
   0x6   :  { %147 = vmatprep.mubr.msk.bf16.mxu0 %vm19_vm0, %v32_v9  ;;  %152 = vmatprep.subr.msk.bf16.mxu0 %vm19_vm0, %v39_v8 }
   0x8   :  { %v26_v15 = vld [vmem:[#allocation2 + $0x10] sm:$0xff] }
   0x9   :  { %v24_v16 = vld [vmem:[#allocation2] sm:$0xff]  ;;  %v25_v21 = vld [vmem:[#allocation2 + $0x8] sm:$0xff] }
   0xa   :  { %v27_v18 = vld [vmem:[#allocation2 + $0x18] sm:$0xff] }
   0xd   :  { %146 = vmatpush3.bf16.xpose.msra.mxu0 %v51_v11 }
  0x14   :  { %148 = vmatmul.mubr.msk.bf16.vlgmr.msra.gmra.mrb[0].mxu0 %vm19_vm0, %v33_v14 }
  0xe7   :  { %v149_v17 = vpop.f32.mrb[0].mxu0 }
  0xe8   :  { %v104_v19 = vadd.f32 %v149_v17, %v26_v15  ;;  %v87_v20 = vpop.f32.mrb[1].mxu0 }
  0xe9   :  { %v102_v22 = vadd.f32 %v87_v20, %v24_v16  ;;  %v150_v23 = vpop.f32.mrb[2].mxu0 }
  0xea   :  { %108 = vst.msk [vmem:[#allocation2 + $0x10] sm:$0xff] %vm19_vm0, %v104_v19  ;;  %v105_v24 = vadd.f32 %v150_v23, %v27_v18  ;;  %v90_v25 = vpop.f32.mrb[3].mxu0 }
  0xeb   :  { %106 = vst.msk [vmem:[#allocation2] sm:$0xff] %vm19_vm0, %v102_v22  ;;  %v103_v26 = vadd.f32 %v90_v25, %v25_v21 }
  0xec   :  { %109 = vst.msk [vmem:[#allocation2 + $0x18] sm:$0xff] %vm19_vm0, %v105_v24 }
  0xed   :  { %107 = vst.msk [vmem:[#allocation2 + $0x8] sm:$0xff] %vm19_vm0, %v103_v26 }
  0xf1   :  { %v115_v28 = vld [vmem:[#allocation2 + $0x10] sm:$0xff] }
  0xf2   :  { %v126_v29 = vadd.f32 %v138_v27, %v115_v28  ;;  %v113_v30 = vld [vmem:[#allocation2] sm:$0xff] }
  0xf3   :  { %v124_v31 = vadd.f32 %v138_v27, %v113_v30  ;;  %v116_v32 = vld [vmem:[#allocation2 + $0x18] sm:$0xff] }
  0xf4   :  { %130 = vst.msk [vmem:[%s235_s3 + $0x10] sm:$0xff] %vm19_vm0, %v126_v29  ;;  %v127_v33 = vadd.f32 %v138_v27, %v116_v32  ;;  %v114_v34 = vld [vmem:[#allocation2 + $0x8] sm:$0xff] }
  0xf5   :  { %128 = vst.msk [vmem:[%s235_s3] sm:$0xff] %vm19_vm0, %v124_v31  ;;  %v125_v35 = vadd.f32 %v138_v27, %v114_v34 }
  0xf6   :  { %131 = vst.msk [vmem:[%s235_s3 + $0x18] sm:$0xff] %vm19_vm0, %v127_v33 }
  0xf7   :  { %129 = vst.msk [vmem:[%s235_s3 + $0x8] sm:$0xff] %vm19_vm0, %v125_v35 }

// kernel: _mha_forward.9
= control target key start
LH: loop header
LB: loop body
LE: loop exit
PB: predicated region body
PF: predicated region fallthrough
CT: control target
= control target key end

     0   :  { %vm20_vm0 = vcmask 261120   ;;  %v163_v2 = vmov 0.0   ;;  %vm164_vm1 = vmmov 0   ;;  %s230_s0 = inlined_call_operand.vmem [shape: f32[16,32], index: 0, kind: input, shape index: {}]   ;;  %s231_s1 = inlined_call_operand.vmem [shape: f32[32,32], index: 1, kind: input, shape index: {}]   ;;  %s232_s2 = inlined_call_operand.vmem [shape: f32[1,32], index: 2, kind: input, shape index: {}]   ;;  %s233_s3 = inlined_call_operand.hbm [shape: f32[16,32], index: 3, kind: output, shape index: {}]  }
   0x1   :  { %v28_v0 = vld [vmem:[%s231_s1] sm:$0xff]  ;;  %v29_v1 = vld [vmem:[%s231_s1 + $0x8] sm:$0xff]  ;;  %126 = vmatprep.subr.bf16.mxu0 %v163_v2  ;;  %21 = vst.msk [vmem:[#allocation2] sm:$0xff] %vm20_vm0, %v163_v2  ;;  %22 = vst.msk [vmem:[#allocation2 + $0x8] sm:$0xff] %vm20_vm0, %v163_v2  ;;  %130 = vmatprep.mubr.msk.bf16.mxu0 %vm164_vm1, %v163_v2 }
   0x2   :  { %v32_v3 = vpack.c.bf16 %v29_v1, %v28_v0  ;;  %v30_v4 = vld [vmem:[%s231_s1 + $0x10] sm:$0xff]  ;;  %v31_v5 = vld [vmem:[%s231_s1 + $0x18] sm:$0xff] }
   0x3   :  { %8 = vsyncpa [#allocation4], 0  ;;  %v33_v7 = vpack.c.bf16 %v31_v5, %v30_v4  ;;  %v25_v9 = vld [vmem:[%s230_s0] sm:$0xff]  ;;  %v26_v10 = vld [vmem:[%s230_s0 + $0x8] sm:$0xff]  ;;  %s165_s0 = smov [#allocation3]  }
   0x4   :  { %v39_v6 = vsel %vm20_vm0, %v32_v3, 0  ;;  %v27_v11 = vpack.c.bf16 %v26_v10, %v25_v9  ;;  %v122_v20 = vld [vmem:[%s232_s2] ss:$0 sm:$0xff]  ;;  %s110_s25 = sshll.u32 %s165_s0, 4  ;;  %s111_s25 = int_to_ptr.vmem [resolvable:$true] %s110_s25 }
   0x5   :  { %127 = vmatpush3.bf16.xpose.msra.mxu0 %v39_v6  ;;  %v42_v8 = vsel %vm20_vm0, %v33_v7, 0  ;;  %s139_s26 = scalar_lea.vmem %s111_s25, 256  ;;  %p144_p1 = scmp.lt.s32.totalorder %s111_s25, %s111_s25 }
   0x6   :  { %128 = vmatprep.subr.bf16.mxu0 %v163_v2  ;;  %p140_p0 = scmp.ne.s32.totalorder %s111_s25, %s139_s26  ;;  %p145_p2 = scmp.lt.s32.totalorder %s139_s26, %s139_s26 }
   0x8   :  { %v23_v12 = vld [vmem:[#allocation2] sm:$0xff]  ;;  %v24_v14 = vld [vmem:[#allocation2 + $0x8] sm:$0xff]  ;;  %p146_p3 = por %p145_p2, %p144_p1 }
   0xa   :  { %p147_p4 = pnand %p146_p3, %p140_p0 }
   0xd   :  { %129 = vmatpush3.bf16.xpose.msra.mxu0 %v42_v8 }
  0x14   :  { %131 = vmatmul.mubr.msk.bf16.vlgmr.msra.gmra.mrb[0].mxu0 %vm20_vm0, %v27_v11 }
  0xe7   :  { %v78_v13 = vpop.f32.mrb[0].mxu0 }
  0xe8   :  { %v85_v15 = vadd.f32 %v78_v13, %v23_v12  ;;  %v132_v16 = vpop.f32.mrb[1].mxu0 }
  0xe9   :  { %v81_v17 = vpop.f32.mrb[2].mxu0 }
  0xea   :  { %87 = vst.msk [vmem:[#allocation2] sm:$0xff] %vm20_vm0, %v85_v15  ;;  %v86_v18 = vadd.f32 %v81_v17, %v24_v14  ;;  %v133_v19 = vpop.f32.mrb[3].mxu0 }
  0xec   :  { %88 = vst.msk [vmem:[#allocation2 + $0x8] sm:$0xff] %vm20_vm0, %v86_v18 }
  0xf1   :  { %v92_v21 = vld [vmem:[#allocation2] sm:$0xff] }
  0xf2   :  { %v101_v22 = vadd.f32 %v122_v20, %v92_v21 }
  0xf3   :  { %v93_v23 = vld [vmem:[#allocation2 + $0x8] sm:$0xff] }
  0xf4   :  { %v102_v24 = vadd.f32 %v122_v20, %v93_v23  ;;  %103 = vst.msk [vmem:[#allocation3] sm:$0xff] %vm20_vm0, %v101_v22 }
  0xf6   :  { %104 = vst.msk [vmem:[#allocation3 + $0x8] sm:$0xff] %vm20_vm0, %v102_v24 }
  0xf7   :  { %150 = shalt.err (!%p147_p4)
}
  0xf8   :  { %s151_s28 = scalar_lea.hbm %s233_s3, 256 }
  0xf9   :  { %p152_p5 = scmp.ne.s32.totalorder %s233_s3, %s151_s28  ;;  %p155_p6 = scmp.lt.u32.totalorder %s151_s28, %s233_s3 }
  0xfb   :  { %p157_p7 = pnand %p155_p6, %p152_p5 }
  0xfd   :  { %160 = shalt.err (!%p157_p7)
}
  0xfe   :  { %s166_s6 = smov 128   ;;  %s167_s7 = smov 8  }
  0xff   :  { %116 = dma.vmem_to_hbm [thread:$0]  %s111_s25, 256, %s233_s3, [#allocation4], %s166_s6, %s166_s6, %s167_s7  }
 0x100   :  { %161 = dma.done.wait [#allocation4], 256  }
 0x101   :  { %162 = vsyncadd [#allocation4], 4294967040 }
 0x102   :  { %120 = vsyncpa [#allocation4], 1 }

// kernel: _mha_forward.8
= control target key start
LH: loop header
LB: loop body
LE: loop exit
PB: predicated region body
PF: predicated region fallthrough
CT: control target
= control target key end

     0   :  { %vm74_vm0 = vcmask 64512   ;;  %v1133_v3 = vmov 0.0   ;;  %vm1134_vm1 = vmmov 0   ;;  %s1447_s0 = inlined_call_operand.vmem [shape: f32[8,8,8], index: 0, kind: input, shape index: {}]   ;;  %s1448_s1 = inlined_call_operand.vmem [shape: f32[8,16,8], index: 1, kind: input, shape index: {}]   ;;  %s1449_s2 = inlined_call_operand.vmem [shape: f32[8,16,8], index: 2, kind: input, shape index: {}]   ;;  %s1450_s3 = inlined_call_operand.vmem [shape: f32[8,8,8], index: 3, kind: output, shape index: {0}]   ;;  %s1451_s4 = inlined_call_operand.hbm [shape: f32[8,8,16], index: 4, kind: output, shape index: {1}]  }
   0x1   :  { %v26_v0 = vld [vmem:[%s1448_s1] sm:$0xff]  ;;  %v27_v1 = vld [vmem:[%s1448_s1 + $0x8] sm:$0xff]  ;;  %v28_v2 = vld [vmem:[%s1448_s1 + $0x10] sm:$0xff]  ;;  %976 = vmatprep.subr.bf16.mxu0 %v1133_v3  ;;  %982 = vmatprep.subr.bf16.mxu1 %v1133_v3 }
   0x2   :  { %v66_v4 = vpack.c.bf16 %v27_v1, %v26_v0  ;;  %v29_v5 = vld [vmem:[%s1448_s1 + $0x18] sm:$0xff]  ;;  %978 = vmatprep.mubr.msk.bf16.mxu0 %vm1134_vm1, %v1133_v3  ;;  %984 = vmatprep.mubr.msk.bf16.mxu1 %vm1134_vm1, %v1133_v3  ;;  %v30_v7 = vld [vmem:[%s1448_s1 + $0x20] sm:$0xff]  ;;  %v31_v8 = vld [vmem:[%s1448_s1 + $0x28] sm:$0xff] }
   0x3   :  { %v67_v6 = vpack.c.bf16 %v29_v5, %v28_v2  ;;  %v32_v10 = vld [vmem:[%s1448_s1 + $0x30] sm:$0xff]  ;;  %v33_v11 = vld [vmem:[%s1448_s1 + $0x38] sm:$0xff]  ;;  %v18_v13 = vld [vmem:[%s1447_s0] sm:$0xff]  ;;  %v68_v15 = vpack.c.bf16 %v31_v8, %v30_v7 }
   0x4   :  { %v79_v9 = vsel %vm74_vm0, %v66_v4, 0  ;;  %v19_v14 = vld [vmem:[%s1447_s0 + $0x8] sm:$0xff]  ;;  %v69_v16 = vpack.c.bf16 %v33_v11, %v32_v10  ;;  %v58_v17 = vpack.c.bf16 %v18_v13, %v18_v13 }
   0x5   :  { %977 = vmatpush3.bf16.xpose.msra.mxu0 %v79_v9  ;;  %v125_v12 = vsel %vm74_vm0, %v67_v6, 0  ;;  %v59_v18 = vpack.c.bf16 %v19_v14, %v19_v14 }
   0x6   :  { %983 = vmatpush3.bf16.xpose.msra.mxu1 %v125_v12  ;;  %988 = vmatprep.subr.bf16.mxu0 %v1133_v3 }
   0x7   :  { %994 = vmatprep.subr.bf16.mxu1 %v1133_v3 }
   0x8   :  { %10 = vsyncpa [#allocation3], 0  ;;  %v171_v19 = vsel %vm74_vm0, %v68_v15, 0  ;;  %v217_v20 = vsel %vm74_vm0, %v69_v16, 0  ;;  %v34_v21 = vld [vmem:[%s1448_s1 + $0x40] sm:$0xff]  ;;  %v35_v22 = vld [vmem:[%s1448_s1 + $0x48] sm:$0xff] }
   0x9   :  { %v36_v23 = vld [vmem:[%s1448_s1 + $0x50] sm:$0xff]  ;;  %v37_v24 = vld [vmem:[%s1448_s1 + $0x58] sm:$0xff]  ;;  %v70_v27 = vpack.c.bf16 %v35_v22, %v34_v21  ;;  %v38_v33 = vld [vmem:[%s1448_s1 + $0x60] sm:$0xff]  ;;  %vm443_vm2 = vcmask 130048  }
   0xa   :  { %v20_v25 = vld [vmem:[%s1447_s0 + $0x10] sm:$0xff]  ;;  %v21_v26 = vld [vmem:[%s1447_s0 + $0x18] sm:$0xff]  ;;  %v71_v28 = vpack.c.bf16 %v37_v24, %v36_v23  ;;  %v39_v34 = vld [vmem:[%s1448_s1 + $0x68] sm:$0xff] }
   0xb   :  { %v60_v29 = vpack.c.bf16 %v20_v25, %v20_v25  ;;  %v61_v30 = vpack.c.bf16 %v21_v26, %v21_v26  ;;  %v263_v31 = vsel %vm74_vm0, %v70_v27, 0  ;;  %v40_v35 = vld [vmem:[%s1448_s1 + $0x70] sm:$0xff]  ;;  %v41_v36 = vld [vmem:[%s1448_s1 + $0x78] sm:$0xff]  ;;  %v22_v37 = vld [vmem:[%s1447_s0 + $0x20] sm:$0xff]  ;;  %v72_v39 = vpack.c.bf16 %v39_v34, %v38_v33 }
   0xc   :  { %979 = vmatmul.mubr.msk.bf16.vlgmr.msra.gmra.mrb[0].mxu0 %vm74_vm0, %v58_v17  ;;  %v309_v32 = vsel %vm74_vm0, %v71_v28, 0  ;;  %v23_v38 = vld [vmem:[%s1447_s0 + $0x28] sm:$0xff]  ;;  %v73_v40 = vpack.c.bf16 %v41_v36, %v40_v35  ;;  %v62_v41 = vpack.c.bf16 %v22_v37, %v22_v37  ;;  %v24_v45 = vld [vmem:[%s1447_s0 + $0x30] sm:$0xff]  ;;  %v25_v46 = vld [vmem:[%s1447_s0 + $0x38] sm:$0xff] }
   0xd   :  { %985 = vmatmul.mubr.msk.bf16.vlgmr.msra.gmra.mrb[0].mxu1 %vm74_vm0, %v59_v18  ;;  %989 = vmatpush3.bf16.xpose.msra.mxu0 %v171_v19  ;;  %v63_v42 = vpack.c.bf16 %v23_v38, %v23_v38  ;;  %v355_v43 = vsel %vm74_vm0, %v72_v39, 0  ;;  %v64_v47 = vpack.c.bf16 %v24_v45, %v24_v45  ;;  %v65_v48 = vpack.c.bf16 %v25_v46, %v25_v46 }
   0xe   :  { %995 = vmatpush3.bf16.xpose.msra.mxu1 %v217_v20  ;;  %990 = vmatprep.mubr.msk.bf16.mxu0 %vm1134_vm1, %v1133_v3  ;;  %v401_v44 = vsel %vm74_vm0, %v73_v40, 0 }
   0xf   :  { %996 = vmatprep.mubr.msk.bf16.mxu1 %vm1134_vm1, %v1133_v3  ;;  %1000 = vmatprep.subr.bf16.mxu0 %v1133_v3 }
  0x10   :  { %1006 = vmatprep.subr.bf16.mxu1 %v1133_v3 }
  0x14   :  { %991 = vmatmul.mubr.msk.bf16.vlgmr.msra.gmra.mrb[4].mxu0 %vm74_vm0, %v60_v29 }
  0x15   :  { %997 = vmatmul.mubr.msk.bf16.vlgmr.msra.gmra.mrb[4].mxu1 %vm74_vm0, %v61_v30  ;;  %1001 = vmatpush3.bf16.xpose.msra.mxu0 %v263_v31 }
  0x16   :  { %1007 = vmatpush3.bf16.xpose.msra.mxu1 %v309_v32  ;;  %1002 = vmatprep.mubr.msk.bf16.mxu0 %vm1134_vm1, %v1133_v3 }
  0x17   :  { %1008 = vmatprep.mubr.msk.bf16.mxu1 %vm1134_vm1, %v1133_v3  ;;  %1012 = vmatprep.subr.bf16.mxu0 %v1133_v3 }
  0x18   :  { %1018 = vmatprep.subr.bf16.mxu1 %v1133_v3 }
  0x1c   :  { %1003 = vmatmul.mubr.msk.bf16.vlgmr.msra.gmra.mrb[8].mxu0 %vm74_vm0, %v62_v41 }
  0x1d   :  { %1009 = vmatmul.mubr.msk.bf16.vlgmr.msra.gmra.mrb[8].mxu1 %vm74_vm0, %v63_v42  ;;  %1013 = vmatpush3.bf16.xpose.msra.mxu0 %v355_v43 }
  0x1e   :  { %1019 = vmatpush3.bf16.xpose.msra.mxu1 %v401_v44  ;;  %1014 = vmatprep.mubr.msk.bf16.mxu0 %vm1134_vm1, %v1133_v3 }
  0x1f   :  { %1020 = vmatprep.mubr.msk.bf16.mxu1 %vm1134_vm1, %v1133_v3  ;;  %1024 = vmatprep.subr.bf16.mxu0 %v1133_v3 }
  0x20   :  { %1030 = vmatprep.subr.bf16.mxu1 %v1133_v3 }
  0x24   :  { %1015 = vmatmul.mubr.msk.bf16.vlgmr.msra.gmra.mrb[12].mxu0 %vm74_vm0, %v64_v47 }
  0x25   :  { %1021 = vmatmul.mubr.msk.bf16.vlgmr.msra.gmra.mrb[12].mxu1 %vm74_vm0, %v65_v48  ;;  %1026 = vmatprep.mubr.msk.bf16.mxu0 %vm1134_vm1, %v1133_v3 }
  0x26   :  { %1032 = vmatprep.mubr.msk.bf16.mxu1 %vm1134_vm1, %v1133_v3 }
  0xdf   :  { %v115_v49 = vpop.f32.mrb[0].mxu0 }
  0xe0   :  { %v980_v50 = vpop.f32.mrb[1].mxu0  ;;  %v161_v51 = vpop.f32.mrb[0].mxu1  ;;  %v444_v52 = vsel %vm443_vm2, %v115_v49, -inf }
  0xe1   :  { %445 = vmax.xlane.f32.xlu0 %v444_v52  ;;  %v118_v53 = vpop.f32.mrb[2].mxu0  ;;  %v986_v54 = vpop.f32.mrb[1].mxu1  ;;  %v447_v57 = vsel %vm443_vm2, %v161_v51, -inf }
  0xe2   :  { %v981_v55 = vpop.f32.mrb[3].mxu0  ;;  %v164_v56 = vpop.f32.mrb[2].mxu1 }
  0xe3   :  { %v987_v58 = vpop.f32.mrb[3].mxu1 }
  0xe5   :  { %448 = vmax.xlane.f32.xlu0 %v447_v57 }
  0xe7   :  { %v207_v59 = vpop.f32.mrb[4].mxu0 }
  0xe8   :  { %v992_v60 = vpop.f32.mrb[5].mxu0  ;;  %v253_v61 = vpop.f32.mrb[4].mxu1  ;;  %v450_v62 = vsel %vm443_vm2, %v207_v59, -inf }
  0xe9   :  { %451 = vmax.xlane.f32.xlu1 %v450_v62  ;;  %v210_v63 = vpop.f32.mrb[6].mxu0  ;;  %v998_v0 = vpop.f32.mrb[5].mxu1  ;;  %v453_v4 = vsel %vm443_vm2, %v253_v61, -inf }
  0xea   :  { %v993_v1 = vpop.f32.mrb[7].mxu0  ;;  %v256_v2 = vpop.f32.mrb[6].mxu1 }
  0xeb   :  { %v999_v5 = vpop.f32.mrb[7].mxu1  ;;  %v42_v2 = vld [vmem:[%s1449_s2] sm:$0xff] }
  0xed   :  { %454 = vmax.xlane.f32.xlu1 %v453_v4  ;;  %v43_v4 = vld [vmem:[%s1449_s2 + $0x8] sm:$0xff] }
  0xee   :  { %v540_v5 = vpack.c.bf16 %v43_v4, %v42_v2 }
  0xef   :  { %v299_v6 = vpop.f32.mrb[8].mxu0 }
  0xf0   :  { %v345_v7 = vpop.f32.mrb[8].mxu1  ;;  %v456_v8 = vsel %vm443_vm2, %v299_v6, -inf  ;;  %v1004_v9 = vpop.f32.mrb[9].mxu0  ;;  %1025 = vmatpush3.bf16.msra.mxu0 %v540_v5 }
  0xf1   :  { %v459_v10 = vsel %vm443_vm2, %v345_v7, -inf  ;;  %457 = vmax.xlane.f32.xlu0 %v456_v8  ;;  %v1010_v11 = vpop.f32.mrb[9].mxu1  ;;  %v302_v12 = vpop.f32.mrb[10].mxu0  ;;  %1036 = vmatprep.subr.bf16.mxu0 %v1133_v3 }
  0xf2   :  { %460 = vmax.xlane.f32.xlu1 %v459_v10  ;;  %v348_v13 = vpop.f32.mrb[10].mxu1  ;;  %v1005_v14 = vpop.f32.mrb[11].mxu0  ;;  %v46_v12 = vld [vmem:[%s1449_s2 + $0x20] sm:$0xff] }
  0xf3   :  { %v1011_v15 = vpop.f32.mrb[11].mxu1  ;;  %v47_v13 = vld [vmem:[%s1449_s2 + $0x28] sm:$0xff] }
  0xf7   :  { %v391_v16 = vpop.f32.mrb[12].mxu0 }
  0xf8   :  { %v437_v17 = vpop.f32.mrb[12].mxu1  ;;  %v462_v18 = vsel %vm443_vm2, %v391_v16, -inf  ;;  %v1016_v19 = vpop.f32.mrb[13].mxu0 }
  0xf9   :  { %v465_v20 = vsel %vm443_vm2, %v437_v17, -inf  ;;  %463 = vmax.xlane.f32.xlu0 %v462_v18  ;;  %v1022_v21 = vpop.f32.mrb[13].mxu1  ;;  %v394_v22 = vpop.f32.mrb[14].mxu0  ;;  %v48_v19 = vld [vmem:[%s1449_s2 + $0x30] sm:$0xff] }
  0xfa   :  { %466 = vmax.xlane.f32.xlu1 %v465_v20  ;;  %v440_v23 = vpop.f32.mrb[14].mxu1  ;;  %v1017_v24 = vpop.f32.mrb[15].mxu0  ;;  %v49_v20 = vld [vmem:[%s1449_s2 + $0x38] sm:$0xff] }
  0xfb   :  { %v1023_v25 = vpop.f32.mrb[15].mxu1 }
  0xfc   :  { %v543_v25 = vpack.c.bf16 %v49_v20, %v48_v19 }
 0x16e   :  { %v446_v26 = vpop.xlane.xlu0 %445 }
 0x16f   :  { %v468_v27 = vsub.f32 %v115_v49, %v446_v26 }
 0x171   :  { %v476_v28 = vmul.f32 1.442695, %v468_v27  ;;  %v50_v27 = vld [vmem:[%s1449_s2 + $0x40] sm:$0xff] }
 0x172   :  { %v449_v29 = vpop.xlane.xlu0 %448 }
 0x173   :  { %1077 = vpow2.f32 %v476_v28  ;;  %v469_v30 = vsub.f32 %v161_v51, %v449_v29  ;;  %v51_v28 = vld [vmem:[%s1449_s2 + $0x48] sm:$0xff] }
 0x175   :  { %v478_v31 = vmul.f32 1.442695, %v469_v30 }
 0x176   :  { %v452_v32 = vpop.xlane.xlu1 %451 }
 0x177   :  { %1079 = vpow2.f32 %v478_v31  ;;  %v470_v33 = vsub.f32 %v207_v59, %v452_v32  ;;  %v544_v31 = vpack.c.bf16 %v51_v28, %v50_v27 }
 0x179   :  { %v480_v34 = vmul.f32 1.442695, %v470_v33  ;;  %v52_v33 = vld [vmem:[%s1449_s2 + $0x50] sm:$0xff] }
 0x17a   :  { %v455_v35 = vpop.xlane.xlu1 %454 }
 0x17b   :  { %1081 = vpow2.f32 %v480_v34  ;;  %v471_v36 = vsub.f32 %v253_v61, %v455_v35  ;;  %v53_v34 = vld [vmem:[%s1449_s2 + $0x58] sm:$0xff] }
 0x17d   :  { %v1078_v37 = vpop.eup %1077  ;;  %v482_v38 = vmul.f32 1.442695, %v471_v36 }
 0x17e   :  { %v458_v39 = vpop.xlane.xlu0 %457  ;;  %v492_v40 = vsel %vm443_vm2, %v1078_v37, 0.0 }
 0x17f   :  { %1083 = vpow2.f32 %v482_v38  ;;  %v461_v41 = vpop.xlane.xlu1 %460  ;;  %v472_v42 = vsub.f32 %v299_v6, %v458_v39  ;;  %493 = vadd.xlane.f32.xlu0 %v492_v40  ;;  %v44_v6 = vld [vmem:[%s1449_s2 + $0x10] sm:$0xff]  ;;  %v545_v39 = vpack.c.bf16 %v53_v34, %v52_v33 }
 0x180   :  { %v473_v43 = vsub.f32 %v345_v7, %v461_v41  ;;  %v45_v7 = vld [vmem:[%s1449_s2 + $0x18] sm:$0xff]  ;;  %v54_v41 = vld [vmem:[%s1449_s2 + $0x60] sm:$0xff] }
 0x181   :  { %v1080_v44 = vpop.eup %1079  ;;  %v484_v45 = vmul.f32 1.442695, %v472_v42  ;;  %v541_v8 = vpack.c.bf16 %v45_v7, %v44_v6  ;;  %v55_v42 = vld [vmem:[%s1449_s2 + $0x68] sm:$0xff] }
 0x182   :  { %v486_v46 = vmul.f32 1.442695, %v473_v43  ;;  %v495_v47 = vsel %vm443_vm2, %v1080_v44, 0.0 }
 0x183   :  { %1085 = vpow2.f32 %v484_v45  ;;  %496 = vadd.xlane.f32.xlu1 %v495_v47  ;;  %1031 = vmatpush3.bf16.msra.mxu1 %v541_v8  ;;  %v546_v47 = vpack.c.bf16 %v55_v42, %v54_v41 }
 0x184   :  { %1087 = vpow2.f32 %v486_v46  ;;  %1042 = vmatprep.subr.bf16.mxu1 %v1133_v3 }
 0x185   :  { %v1291_v48 = vpop.eup %1081 }
 0x186   :  { %v464_v49 = vpop.xlane.xlu0 %463  ;;  %v498_v50 = vsel %vm443_vm2, %v1291_v48, 0.0 }
 0x187   :  { %v467_v51 = vpop.xlane.xlu1 %466  ;;  %v474_v52 = vsub.f32 %v391_v16, %v464_v49  ;;  %499 = vadd.xlane.f32.xlu0 %v498_v50  ;;  %v56_v49 = vld [vmem:[%s1449_s2 + $0x70] sm:$0xff]  ;;  %v57_v50 = vld [vmem:[%s1449_s2 + $0x78] sm:$0xff]  ;;  %s1135_s2 = smov [#allocation2]  }
 0x188   :  { %v475_v53 = vsub.f32 %v437_v17, %v467_v51  ;;  %v542_v17 = vpack.c.bf16 %v47_v13, %v46_v12  ;;  %v547_v51 = vpack.c.bf16 %v57_v50, %v56_v49  ;;  %s915_s13 = sshll.u32 %s1135_s2, 4  ;;  %s916_s13 = int_to_ptr.vmem [resolvable:$true] %s915_s13 }
 0x189   :  { %v1295_v54 = vpop.eup %1083  ;;  %v488_v55 = vmul.f32 1.442695, %v474_v52  ;;  %s1109_s14 = scalar_lea.vmem %s916_s13, 1024  ;;  %p1114_p1 = scmp.lt.s32.totalorder %s916_s13, %s916_s13 }
 0x18a   :  { %v490_v56 = vmul.f32 1.442695, %v475_v53  ;;  %v501_v57 = vsel %vm443_vm2, %v1295_v54, 0.0  ;;  %p1110_p0 = scmp.ne.s32.totalorder %s916_s13, %s1109_s14  ;;  %p1115_p2 = scmp.lt.s32.totalorder %s1109_s14, %s1109_s14 }
 0x18b   :  { %1089 = vpow2.f32 %v488_v55  ;;  %502 = vadd.xlane.f32.xlu1 %v501_v57 }
 0x18c   :  { %1091 = vpow2.f32 %v490_v56  ;;  %p1116_p3 = por %p1115_p2, %p1114_p1 }
 0x18d   :  { %v1299_v58 = vpop.eup %1085 }
 0x18e   :  { %v1301_v59 = vpop.eup %1087  ;;  %v504_v60 = vsel %vm443_vm2, %v1299_v58, 0.0  ;;  %p1117_p4 = pnand %p1116_p3, %p1110_p0 }
 0x18f   :  { %v507_v61 = vsel %vm443_vm2, %v1301_v59, 0.0  ;;  %505 = vadd.xlane.f32.xlu0 %v504_v60 }
 0x190   :  { %508 = vadd.xlane.f32.xlu1 %v507_v61 }
 0x195   :  { %v1307_v62 = vpop.eup %1089 }
 0x196   :  { %v1309_v63 = vpop.eup %1091  ;;  %v510_v0 = vsel %vm443_vm2, %v1307_v62, 0.0 }
 0x197   :  { %v513_v1 = vsel %vm443_vm2, %v1309_v63, 0.0  ;;  %511 = vadd.xlane.f32.xlu0 %v510_v0 }
 0x198   :  { %514 = vadd.xlane.f32.xlu1 %v513_v1 }
 0x20c   :  { %v494_v9 = vpop.xlane.xlu0 %493 }
 0x20d   :  { %1093 = vrcp.f32 %v494_v9 }
 0x210   :  { %v497_v10 = vpop.xlane.xlu1 %496 }
 0x211   :  { %1095 = vrcp.f32 %v497_v10 }
 0x214   :  { %v500_v11 = vpop.xlane.xlu0 %499 }
 0x215   :  { %1097 = vrcp.f32 %v500_v11 }
 0x217   :  { %v1094_v14 = vpop.eup %1093 }
 0x218   :  { %v517_v15 = vmul.f32 %v1094_v14, %v1078_v37  ;;  %v503_v16 = vpop.xlane.xlu1 %502 }
 0x219   :  { %1099 = vrcp.f32 %v503_v16 }
 0x21a   :  { %900 = vst.msk [vmem:[#allocation2] sm:$0xff] %vm443_vm2, %v517_v15  ;;  %v532_v18 = vpack.c.bf16 %v517_v15, %v517_v15 }
 0x21b   :  { %v1096_v21 = vpop.eup %1095 }
 0x21c   :  { %v519_v22 = vmul.f32 %v1096_v21, %v1080_v44  ;;  %1027 = vmatmul.mubr.msk.bf16.vlgmr.msra.gmra.mrb[16].mxu0 %vm443_vm2, %v532_v18  ;;  %v506_v23 = vpop.xlane.xlu0 %505 }
 0x21d   :  { %v509_v24 = vpop.xlane.xlu1 %508  ;;  %1101 = vrcp.f32 %v506_v23  ;;  %1037 = vmatpush3.bf16.msra.mxu0 %v542_v17  ;;  %1038 = vmatprep.mubr.msk.bf16.mxu0 %vm1134_vm1, %v1133_v3 }
 0x21e   :  { %901 = vst.msk [vmem:[#allocation2 + $0x8] sm:$0xff] %vm443_vm2, %v519_v22  ;;  %1103 = vrcp.f32 %v509_v24  ;;  %v533_v26 = vpack.c.bf16 %v519_v22, %v519_v22  ;;  %1048 = vmatprep.subr.bf16.mxu0 %v1133_v3 }
 0x21f   :  { %v1098_v29 = vpop.eup %1097 }
 0x220   :  { %v521_v30 = vmul.f32 %v1098_v29, %v1291_v48  ;;  %1033 = vmatmul.mubr.msk.bf16.vlgmr.msra.gmra.mrb[16].mxu1 %vm443_vm2, %v533_v26 }
 0x221   :  { %1043 = vmatpush3.bf16.msra.mxu1 %v543_v25  ;;  %1044 = vmatprep.mubr.msk.bf16.mxu1 %vm1134_vm1, %v1133_v3 }
 0x222   :  { %902 = vst.msk [vmem:[#allocation2 + $0x10] sm:$0xff] %vm443_vm2, %v521_v30  ;;  %v534_v32 = vpack.c.bf16 %v521_v30, %v521_v30  ;;  %1054 = vmatprep.subr.bf16.mxu1 %v1133_v3 }
 0x223   :  { %v1100_v35 = vpop.eup %1099 }
 0x224   :  { %v523_v36 = vmul.f32 %v1100_v35, %v1295_v54  ;;  %1039 = vmatmul.mubr.msk.bf16.vlgmr.msra.gmra.mrb[20].mxu0 %vm443_vm2, %v534_v32  ;;  %v512_v37 = vpop.xlane.xlu0 %511 }
 0x225   :  { %v515_v38 = vpop.xlane.xlu1 %514  ;;  %1105 = vrcp.f32 %v512_v37  ;;  %1049 = vmatpush3.bf16.msra.mxu0 %v544_v31  ;;  %1050 = vmatprep.mubr.msk.bf16.mxu0 %vm1134_vm1, %v1133_v3 }
 0x226   :  { %903 = vst.msk [vmem:[#allocation2 + $0x18] sm:$0xff] %vm443_vm2, %v523_v36  ;;  %1107 = vrcp.f32 %v515_v38  ;;  %v535_v40 = vpack.c.bf16 %v523_v36, %v523_v36  ;;  %1060 = vmatprep.subr.bf16.mxu0 %v1133_v3 }
 0x227   :  { %v1102_v43 = vpop.eup %1101 }
 0x228   :  { %v1104_v44 = vpop.eup %1103  ;;  %v525_v45 = vmul.f32 %v1102_v43, %v1299_v58  ;;  %1045 = vmatmul.mubr.msk.bf16.vlgmr.msra.gmra.mrb[20].mxu1 %vm443_vm2, %v535_v40 }
 0x229   :  { %v527_v46 = vmul.f32 %v1104_v44, %v1301_v59  ;;  %1055 = vmatpush3.bf16.msra.mxu1 %v545_v39  ;;  %1056 = vmatprep.mubr.msk.bf16.mxu1 %vm1134_vm1, %v1133_v3 }
 0x22a   :  { %904 = vst.msk [vmem:[#allocation2 + $0x20] sm:$0xff] %vm443_vm2, %v525_v45  ;;  %v536_v48 = vpack.c.bf16 %v525_v45, %v525_v45  ;;  %1066 = vmatprep.subr.bf16.mxu1 %v1133_v3 }
 0x22b   :  { %905 = vst.msk [vmem:[#allocation2 + $0x28] sm:$0xff] %vm443_vm2, %v527_v46  ;;  %v537_v52 = vpack.c.bf16 %v527_v46, %v527_v46 }
 0x22c   :  { %1051 = vmatmul.mubr.msk.bf16.vlgmr.msra.gmra.mrb[24].mxu0 %vm443_vm2, %v536_v48 }
 0x22d   :  { %1061 = vmatpush3.bf16.msra.mxu0 %v546_v47  ;;  %1062 = vmatprep.mubr.msk.bf16.mxu0 %vm1134_vm1, %v1133_v3 }
 0x22f   :  { %v1106_v53 = vpop.eup %1105 }
 0x230   :  { %v1108_v54 = vpop.eup %1107  ;;  %v529_v55 = vmul.f32 %v1106_v53, %v1307_v62  ;;  %1057 = vmatmul.mubr.msk.bf16.vlgmr.msra.gmra.mrb[24].mxu1 %vm443_vm2, %v537_v52 }
 0x231   :  { %v531_v56 = vmul.f32 %v1108_v54, %v1309_v63  ;;  %1067 = vmatpush3.bf16.msra.mxu1 %v547_v51  ;;  %1068 = vmatprep.mubr.msk.bf16.mxu1 %vm1134_vm1, %v1133_v3 }
 0x232   :  { %906 = vst.msk [vmem:[#allocation2 + $0x30] sm:$0xff] %vm443_vm2, %v529_v55  ;;  %v538_v57 = vpack.c.bf16 %v529_v55, %v529_v55 }
 0x233   :  { %907 = vst.msk [vmem:[#allocation2 + $0x38] sm:$0xff] %vm443_vm2, %v531_v56  ;;  %v539_v58 = vpack.c.bf16 %v531_v56, %v531_v56 }
 0x234   :  { %1063 = vmatmul.mubr.msk.bf16.vlgmr.msra.gmra.mrb[28].mxu0 %vm443_vm2, %v538_v57 }
 0x238   :  { %1069 = vmatmul.mubr.msk.bf16.vlgmr.msra.gmra.mrb[28].mxu1 %vm443_vm2, %v539_v58 }
 0x239   :  { %1120 = shalt.err (!%p1117_p4)
}
 0x23a   :  { %s1121_s17 = scalar_lea.hbm %s1451_s4, 1024 }
 0x23b   :  { %p1122_p5 = scmp.ne.s32.totalorder %s1451_s4, %s1121_s17  ;;  %p1125_p6 = scmp.lt.u32.totalorder %s1121_s17, %s1451_s4 }
 0x23d   :  { %p1127_p7 = pnand %p1125_p6, %p1122_p5 }
 0x23f   :  { %1130 = shalt.err (!%p1127_p7)
}
 0x240   :  { %s1136_s22 = smov 128   ;;  %s1137_s23 = smov 8  }
 0x241   :  { %921 = dma.vmem_to_hbm [thread:$0]  %s916_s13, 1024, %s1451_s4, [#allocation3], %s1136_s22, %s1136_s22, %s1137_s23  }
 0x2ef   :  { %v585_v3 = vpop.f32.mrb[16].mxu0 }
 0x2f0   :  { %892 = vst.msk [vmem:[%s1450_s3] sm:$0xff] %vm74_vm0, %v585_v3  ;;  %v1028_v59 = vpop.f32.mrb[17].mxu0 }
 0x2f1   :  { %v588_v60 = vpop.f32.mrb[18].mxu0 }
 0x2f2   :  { %v1029_v61 = vpop.f32.mrb[19].mxu0 }
 0x2f3   :  { %v628_v62 = vpop.f32.mrb[16].mxu1 }
 0x2f4   :  { %893 = vst.msk [vmem:[%s1450_s3 + $0x8] sm:$0xff] %vm74_vm0, %v628_v62  ;;  %v1034_v63 = vpop.f32.mrb[17].mxu1 }
 0x2f5   :  { %v631_v0 = vpop.f32.mrb[18].mxu1 }
 0x2f6   :  { %v1035_v1 = vpop.f32.mrb[19].mxu1 }
 0x2f7   :  { %v671_v2 = vpop.f32.mrb[20].mxu0 }
 0x2f8   :  { %894 = vst.msk [vmem:[%s1450_s3 + $0x10] sm:$0xff] %vm74_vm0, %v671_v2  ;;  %v1040_v4 = vpop.f32.mrb[21].mxu0 }
 0x2f9   :  { %v674_v5 = vpop.f32.mrb[22].mxu0 }
 0x2fa   :  { %v1041_v6 = vpop.f32.mrb[23].mxu0 }
 0x2fb   :  { %v714_v7 = vpop.f32.mrb[20].mxu1 }
 0x2fc   :  { %895 = vst.msk [vmem:[%s1450_s3 + $0x18] sm:$0xff] %vm74_vm0, %v714_v7  ;;  %v1046_v8 = vpop.f32.mrb[21].mxu1 }
 0x2fd   :  { %v717_v9 = vpop.f32.mrb[22].mxu1 }
 0x2fe   :  { %v1047_v10 = vpop.f32.mrb[23].mxu1 }
 0x2ff   :  { %v757_v11 = vpop.f32.mrb[24].mxu0 }
 0x300   :  { %896 = vst.msk [vmem:[%s1450_s3 + $0x20] sm:$0xff] %vm74_vm0, %v757_v11  ;;  %v1052_v12 = vpop.f32.mrb[25].mxu0 }
 0x301   :  { %v760_v13 = vpop.f32.mrb[26].mxu0 }
 0x302   :  { %v1053_v14 = vpop.f32.mrb[27].mxu0 }
 0x303   :  { %v800_v15 = vpop.f32.mrb[24].mxu1 }
 0x304   :  { %897 = vst.msk [vmem:[%s1450_s3 + $0x28] sm:$0xff] %vm74_vm0, %v800_v15  ;;  %v1058_v16 = vpop.f32.mrb[25].mxu1 }
 0x305   :  { %v803_v17 = vpop.f32.mrb[26].mxu1 }
 0x306   :  { %v1059_v18 = vpop.f32.mrb[27].mxu1 }
 0x307   :  { %v843_v19 = vpop.f32.mrb[28].mxu0 }
 0x308   :  { %898 = vst.msk [vmem:[%s1450_s3 + $0x30] sm:$0xff] %vm74_vm0, %v843_v19  ;;  %v1064_v20 = vpop.f32.mrb[29].mxu0 }
 0x309   :  { %v846_v21 = vpop.f32.mrb[30].mxu0 }
 0x30a   :  { %v1065_v22 = vpop.f32.mrb[31].mxu0 }
 0x30b   :  { %v886_v23 = vpop.f32.mrb[28].mxu1 }
 0x30c   :  { %899 = vst.msk [vmem:[%s1450_s3 + $0x38] sm:$0xff] %vm74_vm0, %v886_v23  ;;  %v1070_v24 = vpop.f32.mrb[29].mxu1 }
 0x30d   :  { %v889_v25 = vpop.f32.mrb[30].mxu1 }
 0x30e   :  { %v1071_v26 = vpop.f32.mrb[31].mxu1 }
 0x30f   :  { %1131 = dma.done.wait [#allocation3], 1024  }
 0x310   :  { %1132 = vsyncadd [#allocation3], 4294966272 }
 0x311   :  { %927 = vsyncpa [#allocation3], 1 }

</bundles_post_ra>
